<compile_context>
chip_gen: v7x
topology: tpu7x:2x2x1
jax: 0.10.0
libtpu: 0.0.40
codegen_flags: <defaults>
</compile_context>

<pallas_src>
import functools

import jax
import jax.numpy as jnp
import numpy as np
from jax.experimental import pallas as pl
from jax.experimental.pallas import tpu as pltpu


def _sepconv_kernel(x_ref, dw_ref, pw_ref, o_ref, *, TH, W_out, KH, KW,
                    stride, dilation, mxu_bf16):
    """Grid = (N, H_out_pad // TH): one batch element x one block of TH output rows.

    x_ref : (1, 1, band_rows, Wp, C)  halo row band (band_rows = (TH-1)*s+1+(KH-1)*d)
    dw_ref: (KH, KW, C)               depthwise filter (f32)
    pw_ref: (C, Co_pad)               pointwise filter (bf16 if mxu_bf16 else f32)
    o_ref : (1, TH, W_out, Co_pad)    output row block
    """
    C = x_ref.shape[-1]
    Co_pad = o_ref.shape[-1]

    dw = dw_ref[...].astype(jnp.float32)          # tiny (KH, KW, C)

    # ---- depthwise: slice each tap straight out of the band, f32 accumulate ----
    acc = jnp.zeros((TH, W_out, C), jnp.float32)
    for kh in range(KH):
        for kw in range(KW):
            h0 = kh * dilation                    # static offsets within the band
            w0 = kw * dilation
            if stride == 1:
                tap = x_ref[0, 0, pl.ds(h0, TH), pl.ds(w0, W_out), :]
            else:
                tap = x_ref[0, 0, pl.ds(h0, TH, stride=stride),
                            pl.ds(w0, W_out, stride=stride), :]
            acc = acc + tap.astype(jnp.float32) * dw[kh, kw, :]

    # ---- pointwise 1x1 conv: one large-M MXU matmul, f32 accumulation ----
    m = TH * W_out
    lhs = acc.reshape(m, C)
    rhs = pw_ref[...]
    if mxu_bf16:
        lhs = lhs.astype(jnp.bfloat16)            # rhs already bf16 (wrapper pre-cast)
    y = jnp.dot(lhs, rhs, preferred_element_type=jnp.float32)   # (m, Co_pad)
    o_ref[...] = y.reshape(1, TH, W_out, Co_pad).astype(o_ref.dtype)


def _pick_row_tile(h_out, w_out, wp, c, co_pad, stride, kh, dilation,
                   in_itemsize, out_itemsize, target_m, vmem_budget):
    """Row tile: target M = TH*W_out ~ target_m, shrink until the block fits VMEM."""
    th = min(h_out, max(1, -(-target_m // w_out)))

    def footprint(t):
        band = (t - 1) * stride + 1 + (kh - 1) * dilation
        return (2 * band * wp * c * in_itemsize            # double-buffered input band
                + 2 * t * w_out * co_pad * out_itemsize    # double-buffered output block
                + 4 * t * w_out * (c + co_pad))            # f32 acc + matmul result

    while th > 1 and footprint(th) > vmem_budget:
        th = max(1, th // 2)
    return th


@functools.partial(jax.jit, static_argnames=("stride", "padding", "dilation",
                                              "use_bf16_matmul", "target_m"))
def separable_conv2d(x_nchw, dw_weight, pw_weight, *, stride=1, padding=0,
                     dilation=1, use_bf16_matmul=None, target_m=512):
    """x_nchw: (N, C, H, W); dw_weight: (C, 1, KH, KW); pw_weight: (Co, C, 1, 1)."""
    N, C, H, W = x_nchw.shape
    Co = pw_weight.shape[0]
    KH, KW = dw_weight.shape[2], dw_weight.shape[3]

    if use_bf16_matmul is None:
        use_bf16_matmul = (x_nchw.dtype == jnp.bfloat16)

    # Output spatial dims (PyTorch Conv2d arithmetic).
    H_out = (H + 2 * padding - dilation * (KH - 1) - 1) // stride + 1
    W_out = (W + 2 * padding - dilation * (KW - 1) - 1) // stride + 1
    Wp = W + 2 * padding

    # Lane-dense Co only when write amplification stays <= 2x.
    Co_pad = ((Co + 127) // 128) * 128
    if Co_pad > 2 * Co:
        Co_pad = Co

    out_dtype = x_nchw.dtype
    in_itemsize = jnp.dtype(x_nchw.dtype).itemsize
    out_itemsize = jnp.dtype(out_dtype).itemsize
    pw_dtype = jnp.bfloat16 if use_bf16_matmul else jnp.float32

    TH = _pick_row_tile(H_out, W_out, Wp, C, Co_pad, stride, KH, dilation,
                        in_itemsize, out_itemsize, target_m, vmem_budget=12 << 20)
    n_blocks = -(-H_out // TH)
    H_out_pad = n_blocks * TH
    band_rows = (TH - 1) * stride + 1 + (KH - 1) * dilation

    # Zero-pad: PyTorch padding + extra bottom rows so the padded H_out rows
    # read zeros (they are sliced off after the kernel).
    Hp_needed = (H_out_pad - 1) * stride + (KH - 1) * dilation + 1
    pad_bottom = padding + max(0, Hp_needed - (H + 2 * padding))
    x = jnp.transpose(x_nchw, (0, 2, 3, 1))                              # NHWC
    x_pad = jnp.pad(x, ((0, 0), (padding, pad_bottom),
                        (padding, padding), (0, 0)))

    # Overlapping halo row bands: (N, n_blocks, band_rows, Wp, C).
    # TODO(synk): replace with pl.Element / manual-DMA halo loads so the halo
    # rows are never duplicated in HBM.
    row_idx = (np.arange(n_blocks)[:, None] * (TH * stride)
               + np.arange(band_rows)[None, :])
    x_bands = x_pad[:, row_idx, :, :]

    dw = jnp.transpose(dw_weight[:, 0, :, :], (1, 2, 0)).astype(jnp.float32)  # (KH,KW,C)
    pw = jnp.transpose(pw_weight[:, :, 0, 0], (1, 0)).astype(pw_dtype)        # (C, Co)
    if Co_pad != Co:
        pw = jnp.pad(pw, ((0, 0), (0, Co_pad - Co)))

    kernel = functools.partial(
        _sepconv_kernel, TH=TH, W_out=W_out, KH=KH, KW=KW,
        stride=stride, dilation=dilation, mxu_bf16=use_bf16_matmul)

    # Explicit scoped-VMEM budget from the real block footprint (+ headroom).
    in_block = band_rows * Wp * C * in_itemsize
    out_block = TH * W_out * Co_pad * out_itemsize
    needed = (2 * (in_block + out_block)
              + dw.size * 4 + pw.size * pw.dtype.itemsize
              + 4 * TH * W_out * (C + Co_pad))
    vmem_limit = min(max(int(needed * 1.5) + (2 << 20), 8 << 20), 48 << 20)

    flops = (2 * N * H_out_pad * W_out * C * KH * KW
             + 2 * N * H_out_pad * W_out * C * Co_pad)
    bytes_accessed = (x_bands.size * in_itemsize + dw.size * 4
                      + pw.size * pw.dtype.itemsize
                      + N * H_out_pad * W_out * Co_pad * out_itemsize)

    out = pl.pallas_call(
        kernel,
        out_shape=jax.ShapeDtypeStruct((N, H_out_pad, W_out, Co_pad), out_dtype),
        grid=(N, n_blocks),
        in_specs=[
            # one halo row band per step -> small, double-buffered by Pallas
            pl.BlockSpec((1, 1, band_rows, Wp, C), lambda n, j: (n, j, 0, 0, 0)),
            pl.BlockSpec((KH, KW, C), lambda n, j: (0, 0, 0)),      # resident
            pl.BlockSpec((C, Co_pad), lambda n, j: (0, 0)),         # resident
        ],
        out_specs=pl.BlockSpec((1, TH, W_out, Co_pad), lambda n, j: (n, j, 0, 0)),
        compiler_params=pltpu.CompilerParams(
            dimension_semantics=("parallel", "parallel"),
            vmem_limit_bytes=vmem_limit),
        cost_estimate=pl.CostEstimate(
            flops=flops, transcendentals=0, bytes_accessed=bytes_accessed),
    )(x_bands, dw, pw)

    out = out[:, :H_out, :, :Co]                 # drop row / Co padding (fused w/ transpose)
    return jnp.transpose(out, (0, 3, 1, 2))      # back to NCHW


def _reference(x, dw_weight, pw_weight, *, stride, padding, dilation):
    """Pure-JAX reference mirroring the PyTorch module exactly (NCHW)."""
    y = jax.lax.conv_general_dilated(
        x, dw_weight,
        window_strides=(stride, stride),
        padding=((padding, padding), (padding, padding)),
        rhs_dilation=(dilation, dilation),
        dimension_numbers=("NCHW", "OIHW", "NCHW"),
        feature_group_count=x.shape[1])
    z = jax.lax.conv_general_dilated(
        y, pw_weight,
        window_strides=(1, 1), padding="VALID",
        dimension_numbers=("NCHW", "OIHW", "NCHW"))
    return z


def _run_case(key, *, N, Cin, Cout, H, W, k, stride, padding, dilation, target_m=512):
    kx, kdw, kpw = jax.random.split(key, 3)
    x = jax.random.normal(kx, (N, Cin, H, W), dtype=jnp.float32)
    dw_weight = 0.1 * jax.random.normal(kdw, (Cin, 1, k, k), dtype=jnp.float32)
    pw_weight = 0.1 * jax.random.normal(kpw, (Cout, Cin, 1, 1), dtype=jnp.float32)

    out = separable_conv2d(x, dw_weight, pw_weight, stride=stride,
                           padding=padding, dilation=dilation, target_m=target_m)
    out = jax.block_until_ready(out)
    ref = jax.block_until_ready(_reference(x, dw_weight, pw_weight, stride=stride,
                                           padding=padding, dilation=dilation))
    np.testing.assert_allclose(np.asarray(out), np.asarray(ref),
                               rtol=1e-4, atol=1e-5)


if __name__ == "__main__":
    key = jax.random.PRNGKey(0)
    k1, k2, k3 = jax.random.split(key, 3)

    # SeparableConv2d(4, 8, kernel_size=3, padding=1) — tiny Co (unpadded, masked stores)
    _run_case(k1, N=2, Cin=4, Cout=8, H=16, W=16, k=3,
              stride=1, padding=1, dilation=1)

    # Lane-dense Co=128 path + multiple row blocks per image (forced small target_m)
    _run_case(k2, N=2, Cin=32, Cout=128, H=16, W=16, k=3,
              stride=1, padding=1, dilation=1, target_m=64)

    # Dilated filter path
    _run_case(k3, N=1, Cin=8, Cout=40, H=16, W=16, k=3,
              stride=1, padding=2, dilation=2)

    print("KERNEL_OK")
</pallas_src>

<mosaic_0001>
module attributes {stable_mosaic.version = 11 : i64} {
  func.func @_sepconv_kernel(%arg0: i32, %arg1: i32, %arg2: memref<1x1x18x18x4xf32, #tpu.memory_space<vmem>>, %arg3: memref<3x3x4xf32, #tpu.memory_space<vmem>>, %arg4: memref<4x8xf32, #tpu.memory_space<vmem>>, %arg5: memref<1x16x16x8xf32, #tpu.memory_space<vmem>>) attributes {dimension_semantics = [#tpu.dimension_semantics<parallel>, #tpu.dimension_semantics<parallel>], iteration_bounds = array<i64: 2, 1>, scalar_prefetch = 0 : i64, scratch_operands = 0 : i64, tpu.core_type = #tpu.core_type<tc>, window_params = [{transform_indices = @transform_0, window_bounds = array<i64: 1, 1, 18, 18, 4>}, {pipeline_mode = #tpu.pipeline_mode<synchronous>, transform_indices = @transform_1, window_bounds = array<i64: 3, 3, 4>}, {pipeline_mode = #tpu.pipeline_mode<synchronous>, transform_indices = @transform_2, window_bounds = array<i64: 4, 8>}, {transform_indices = @transform_3, window_bounds = array<i64: 1, 16, 16, 8>}]} {
    %c0 = arith.constant 0 : index
    %c0_0 = arith.constant 0 : index
    %c0_1 = arith.constant 0 : index
    %0 = vector.load %arg3[%c0, %c0_0, %c0_1] : memref<3x3x4xf32, #tpu.memory_space<vmem>>, vector<3x3x4xf32>
    %cst = arith.constant 0.000000e+00 : f32
    %1 = vector.broadcast %cst : f32 to vector<16x16x4xf32>
    %c0_2 = arith.constant 0 : index
    %c0_3 = arith.constant 0 : index
    %c0_4 = arith.constant 0 : index
    %c0_5 = arith.constant 0 : index
    %c0_6 = arith.constant 0 : index
    %2 = vector.load %arg2[%c0_2, %c0_3, %c0_4, %c0_5, %c0_6] : memref<1x1x18x18x4xf32, #tpu.memory_space<vmem>>, vector<1x1x16x16x4xf32>
    %3 = vector.shape_cast %2 : vector<1x1x16x16x4xf32> to vector<16x16x4xf32>
    %4 = vector.extract_strided_slice %0 {offsets = [0, 0, 0], sizes = [1, 1, 4], strides = [1, 1, 1]} : vector<3x3x4xf32> to vector<1x1x4xf32>
    %5 = vector.shape_cast %4 : vector<1x1x4xf32> to vector<4xf32>
    %6 = vector.shape_cast %5 : vector<4xf32> to vector<1x1x4xf32>
    %7 = vector.broadcast %6 : vector<1x1x4xf32> to vector<16x16x4xf32>
    %8 = arith.mulf %3, %7 : vector<16x16x4xf32>
    %9 = arith.addf %1, %8 : vector<16x16x4xf32>
    %c0_7 = arith.constant 0 : index
    %c0_8 = arith.constant 0 : index
    %c0_9 = arith.constant 0 : index
    %c1 = arith.constant 1 : index
    %c0_10 = arith.constant 0 : index
    %10 = vector.load %arg2[%c0_7, %c0_8, %c0_9, %c1, %c0_10] : memref<1x1x18x18x4xf32, #tpu.memory_space<vmem>>, vector<1x1x16x16x4xf32>
    %11 = vector.shape_cast %10 : vector<1x1x16x16x4xf32> to vector<16x16x4xf32>
    %12 = vector.extract_strided_slice %0 {offsets = [0, 1, 0], sizes = [1, 1, 4], strides = [1, 1, 1]} : vector<3x3x4xf32> to vector<1x1x4xf32>
    %13 = vector.shape_cast %12 : vector<1x1x4xf32> to vector<4xf32>
    %14 = vector.shape_cast %13 : vector<4xf32> to vector<1x1x4xf32>
    %15 = vector.broadcast %14 : vector<1x1x4xf32> to vector<16x16x4xf32>
    %16 = arith.mulf %11, %15 : vector<16x16x4xf32>
    %17 = arith.addf %9, %16 : vector<16x16x4xf32>
    %c0_11 = arith.constant 0 : index
    %c0_12 = arith.constant 0 : index
    %c0_13 = arith.constant 0 : index
    %c2 = arith.constant 2 : index
    %c0_14 = arith.constant 0 : index
    %18 = vector.load %arg2[%c0_11, %c0_12, %c0_13, %c2, %c0_14] : memref<1x1x18x18x4xf32, #tpu.memory_space<vmem>>, vector<1x1x16x16x4xf32>
    %19 = vector.shape_cast %18 : vector<1x1x16x16x4xf32> to vector<16x16x4xf32>
    %20 = vector.extract_strided_slice %0 {offsets = [0, 2, 0], sizes = [1, 1, 4], strides = [1, 1, 1]} : vector<3x3x4xf32> to vector<1x1x4xf32>
    %21 = vector.shape_cast %20 : vector<1x1x4xf32> to vector<4xf32>
    %22 = vector.shape_cast %21 : vector<4xf32> to vector<1x1x4xf32>
    %23 = vector.broadcast %22 : vector<1x1x4xf32> to vector<16x16x4xf32>
    %24 = arith.mulf %19, %23 : vector<16x16x4xf32>
    %25 = arith.addf %17, %24 : vector<16x16x4xf32>
    %c0_15 = arith.constant 0 : index
    %c0_16 = arith.constant 0 : index
    %c1_17 = arith.constant 1 : index
    %c0_18 = arith.constant 0 : index
    %c0_19 = arith.constant 0 : index
    %26 = vector.load %arg2[%c0_15, %c0_16, %c1_17, %c0_18, %c0_19] : memref<1x1x18x18x4xf32, #tpu.memory_space<vmem>>, vector<1x1x16x16x4xf32>
    %27 = vector.shape_cast %26 : vector<1x1x16x16x4xf32> to vector<16x16x4xf32>
    %28 = vector.extract_strided_slice %0 {offsets = [1, 0, 0], sizes = [1, 1, 4], strides = [1, 1, 1]} : vector<3x3x4xf32> to vector<1x1x4xf32>
    %29 = vector.shape_cast %28 : vector<1x1x4xf32> to vector<4xf32>
    %30 = vector.shape_cast %29 : vector<4xf32> to vector<1x1x4xf32>
    %31 = vector.broadcast %30 : vector<1x1x4xf32> to vector<16x16x4xf32>
    %32 = arith.mulf %27, %31 : vector<16x16x4xf32>
    %33 = arith.addf %25, %32 : vector<16x16x4xf32>
    %c0_20 = arith.constant 0 : index
    %c0_21 = arith.constant 0 : index
    %c1_22 = arith.constant 1 : index
    %c1_23 = arith.constant 1 : index
    %c0_24 = arith.constant 0 : index
    %34 = vector.load %arg2[%c0_20, %c0_21, %c1_22, %c1_23, %c0_24] : memref<1x1x18x18x4xf32, #tpu.memory_space<vmem>>, vector<1x1x16x16x4xf32>
    %35 = vector.shape_cast %34 : vector<1x1x16x16x4xf32> to vector<16x16x4xf32>
    %36 = vector.extract_strided_slice %0 {offsets = [1, 1, 0], sizes = [1, 1, 4], strides = [1, 1, 1]} : vector<3x3x4xf32> to vector<1x1x4xf32>
    %37 = vector.shape_cast %36 : vector<1x1x4xf32> to vector<4xf32>
    %38 = vector.shape_cast %37 : vector<4xf32> to vector<1x1x4xf32>
    %39 = vector.broadcast %38 : vector<1x1x4xf32> to vector<16x16x4xf32>
    %40 = arith.mulf %35, %39 : vector<16x16x4xf32>
    %41 = arith.addf %33, %40 : vector<16x16x4xf32>
    %c0_25 = arith.constant 0 : index
    %c0_26 = arith.constant 0 : index
    %c1_27 = arith.constant 1 : index
    %c2_28 = arith.constant 2 : index
    %c0_29 = arith.constant 0 : index
    %42 = vector.load %arg2[%c0_25, %c0_26, %c1_27, %c2_28, %c0_29] : memref<1x1x18x18x4xf32, #tpu.memory_space<vmem>>, vector<1x1x16x16x4xf32>
    %43 = vector.shape_cast %42 : vector<1x1x16x16x4xf32> to vector<16x16x4xf32>
    %44 = vector.extract_strided_slice %0 {offsets = [1, 2, 0], sizes = [1, 1, 4], strides = [1, 1, 1]} : vector<3x3x4xf32> to vector<1x1x4xf32>
    %45 = vector.shape_cast %44 : vector<1x1x4xf32> to vector<4xf32>
    %46 = vector.shape_cast %45 : vector<4xf32> to vector<1x1x4xf32>
    %47 = vector.broadcast %46 : vector<1x1x4xf32> to vector<16x16x4xf32>
    %48 = arith.mulf %43, %47 : vector<16x16x4xf32>
    %49 = arith.addf %41, %48 : vector<16x16x4xf32>
    %c0_30 = arith.constant 0 : index
    %c0_31 = arith.constant 0 : index
    %c2_32 = arith.constant 2 : index
    %c0_33 = arith.constant 0 : index
    %c0_34 = arith.constant 0 : index
    %50 = vector.load %arg2[%c0_30, %c0_31, %c2_32, %c0_33, %c0_34] : memref<1x1x18x18x4xf32, #tpu.memory_space<vmem>>, vector<1x1x16x16x4xf32>
    %51 = vector.shape_cast %50 : vector<1x1x16x16x4xf32> to vector<16x16x4xf32>
    %52 = vector.extract_strided_slice %0 {offsets = [2, 0, 0], sizes = [1, 1, 4], strides = [1, 1, 1]} : vector<3x3x4xf32> to vector<1x1x4xf32>
    %53 = vector.shape_cast %52 : vector<1x1x4xf32> to vector<4xf32>
    %54 = vector.shape_cast %53 : vector<4xf32> to vector<1x1x4xf32>
    %55 = vector.broadcast %54 : vector<1x1x4xf32> to vector<16x16x4xf32>
    %56 = arith.mulf %51, %55 : vector<16x16x4xf32>
    %57 = arith.addf %49, %56 : vector<16x16x4xf32>
    %c0_35 = arith.constant 0 : index
    %c0_36 = arith.constant 0 : index
    %c2_37 = arith.constant 2 : index
    %c1_38 = arith.constant 1 : index
    %c0_39 = arith.constant 0 : index
    %58 = vector.load %arg2[%c0_35, %c0_36, %c2_37, %c1_38, %c0_39] : memref<1x1x18x18x4xf32, #tpu.memory_space<vmem>>, vector<1x1x16x16x4xf32>
    %59 = vector.shape_cast %58 : vector<1x1x16x16x4xf32> to vector<16x16x4xf32>
    %60 = vector.extract_strided_slice %0 {offsets = [2, 1, 0], sizes = [1, 1, 4], strides = [1, 1, 1]} : vector<3x3x4xf32> to vector<1x1x4xf32>
    %61 = vector.shape_cast %60 : vector<1x1x4xf32> to vector<4xf32>
    %62 = vector.shape_cast %61 : vector<4xf32> to vector<1x1x4xf32>
    %63 = vector.broadcast %62 : vector<1x1x4xf32> to vector<16x16x4xf32>
    %64 = arith.mulf %59, %63 : vector<16x16x4xf32>
    %65 = arith.addf %57, %64 : vector<16x16x4xf32>
    %c0_40 = arith.constant 0 : index
    %c0_41 = arith.constant 0 : index
    %c2_42 = arith.constant 2 : index
    %c2_43 = arith.constant 2 : index
    %c0_44 = arith.constant 0 : index
    %66 = vector.load %arg2[%c0_40, %c0_41, %c2_42, %c2_43, %c0_44] : memref<1x1x18x18x4xf32, #tpu.memory_space<vmem>>, vector<1x1x16x16x4xf32>
    %67 = vector.shape_cast %66 : vector<1x1x16x16x4xf32> to vector<16x16x4xf32>
    %68 = vector.extract_strided_slice %0 {offsets = [2, 2, 0], sizes = [1, 1, 4], strides = [1, 1, 1]} : vector<3x3x4xf32> to vector<1x1x4xf32>
    %69 = vector.shape_cast %68 : vector<1x1x4xf32> to vector<4xf32>
    %70 = vector.shape_cast %69 : vector<4xf32> to vector<1x1x4xf32>
    %71 = vector.broadcast %70 : vector<1x1x4xf32> to vector<16x16x4xf32>
    %72 = arith.mulf %67, %71 : vector<16x16x4xf32>
    %73 = arith.addf %65, %72 : vector<16x16x4xf32>
    %74 = vector.shape_cast %73 : vector<16x16x4xf32> to vector<256x4xf32>
    %c0_45 = arith.constant 0 : index
    %c0_46 = arith.constant 0 : index
    %75 = vector.load %arg4[%c0_45, %c0_46] : memref<4x8xf32, #tpu.memory_space<vmem>>, vector<4x8xf32>
    %cst_47 = arith.constant dense<0.000000e+00> : vector<256x8xf32>
    %76 = tpu.matmul %74, %75, %cst_47 {dimension_numbers = #tpu.dot_dimension_numbers<[1], [0], [0], [1], [0, 0, 1, 1], [], []>} : vector<256x4xf32>, vector<4x8xf32>, vector<256x8xf32> -> vector<256x8xf32>
    %77 = vector.shape_cast %76 : vector<256x8xf32> to vector<1x16x16x8xf32>
    %c0_48 = arith.constant 0 : index
    %c0_49 = arith.constant 0 : index
    %c0_50 = arith.constant 0 : index
    %c0_51 = arith.constant 0 : index
    %78 = vector.load %arg5[%c0_48, %c0_49, %c0_50, %c0_51] : memref<1x16x16x8xf32, #tpu.memory_space<vmem>>, vector<1x16x16x8xf32>
    tpu.vector_store %arg5[%c0_48, %c0_49, %c0_50, %c0_51], %77 {strides = array<i32>} : memref<1x16x16x8xf32, #tpu.memory_space<vmem>>, vector<1x16x16x8xf32>,
    return
  }
  func.func @transform_0(%arg0: i32, %arg1: i32) -> (i32, i32, i32, i32, i32) {
    %c0_i32 = arith.constant 0 : i32
    %c0_i32_0 = arith.constant 0 : i32
    %c0_i32_1 = arith.constant 0 : i32
    %c0_i32_2 = arith.constant 0 : i32
    return %arg0, %arg1, %c0_i32, %c0_i32_0, %c0_i32_1 : i32, i32, i32, i32, i32
  }
  func.func @transform_1(%arg0: i32, %arg1: i32) -> (i32, i32, i32) {
    %c0_i32 = arith.constant 0 : i32
    %c0_i32_0 = arith.constant 0 : i32
    %c0_i32_1 = arith.constant 0 : i32
    %c0_i32_2 = arith.constant 0 : i32
    return %c0_i32, %c0_i32_0, %c0_i32_1 : i32, i32, i32
  }
  func.func @transform_2(%arg0: i32, %arg1: i32) -> (i32, i32) {
    %c0_i32 = arith.constant 0 : i32
    %c0_i32_0 = arith.constant 0 : i32
    %c0_i32_1 = arith.constant 0 : i32
    return %c0_i32, %c0_i32_0 : i32, i32
  }
  func.func @transform_3(%arg0: i32, %arg1: i32) -> (i32, i32, i32, i32) {
    %c0_i32 = arith.constant 0 : i32
    %c0_i32_0 = arith.constant 0 : i32
    %c0_i32_1 = arith.constant 0 : i32
    return %arg0, %arg1, %c0_i32, %c0_i32_0 : i32, i32, i32, i32
  }
}

</mosaic_0001>

<bundles_post_ra>
// kernel: separable_conv2d.1
= control target key start
LH: loop header
LB: loop body
LE: loop exit
PB: predicated region body
PF: predicated region fallthrough
CT: control target
= control target key end

     0   :  { %s1961_s12 = smov 0   ;;  %s1963_s13 = smov 0   ;;  %s2975_s0 = inlined_call_operand.vmem [shape: f32[2,1,18,18,4], index: 0, kind: input, shape index: {}]   ;;  %s2976_s1 = inlined_call_operand.vmem [shape: f32[3,3,4], index: 1, kind: input, shape index: {}]   ;;  %s2977_s2 = inlined_call_operand.vmem [shape: f32[4,8], index: 2, kind: input, shape index: {}]   ;;  %s2978_s3 = inlined_call_operand.vmem [shape: f32[2,16,16,8], index: 3, kind: output, shape index: {}]  }
   0x1   :  { %s1965_s14 = smov 0  }
   0x2 LB: > { %s25_s15 = sadd.s32 1, %s1935_s13  ;;  %p1575_p0 = scmp.ge.s32.totalorder %s1939_s14, 1  ;;  %s1939_s14 = sphi %s1965_s14, %s13_s14   ;;  %s1935_s13 = sphi %s1963_s13, %s2980_s13   ;;  %s1931_s12 = sphi %s1961_s12, %s2979_s12  }
   0x3   : > { %p27_p1 = scmp.ge.s32.totalorder %s25_s15, 2  ;;  %p157_p2 = scmp.lt.s32.totalorder %s1939_s14, 3 }
   0x5   : > { %s2982_s15 = smov (%p27_p1, %s25_s15), 0  ;;  %p158_p3 = pnand %p1575_p0, %p157_p2 }
   0x6   : > { %v1115_v0 = vld [vmem:[%s2977_s2] sm:$0xf] (!%p158_p3)  ;;  %vm1213_vm0 = vcmask (!%p158_p3), 1043456   ;;  %p190_p4 = scmp.lt.s32.totalorder (!%p158_p3), %s1931_s12, 1  ;;  %v245_v1 = vlaneseq (!%p158_p3)  ;;  %v211_v4 = vld [vmem:[%s2976_s1 + $0x4] sm:$0x7] (!%p158_p3) }
   0x7   : > { %161 = sbr.rel (%p158_p3) target bundleno = 378 (0x17a), region = 32  ;;  %1840 = vmatprep.subr.msk.mxu0 (!%p158_p3), %vm1213_vm0, %v1115_v0  ;;  %1890 = vmatprep.subr.msk.mxu1 (!%p158_p3), %vm1213_vm0, %v1115_v0  ;;  %v210_v3 = vld [vmem:[%s2976_s1] sm:$0x7] (!%p158_p3)  ;;  %v212_v5 = vld [vmem:[%s2976_s1 + $0x8] sm:$0x7] (!%p158_p3)  ;;  %vm1116_vm1 = vcmask (!%p158_p3), 31744  }
   0x8   : > { %1841 = vmatpush3.msk.msra.mxu0 (!%p158_p3), %vm1213_vm0, %v1115_v0  ;;  %1891 = vmatpush3.msk.msra.mxu1 (!%p158_p3), %vm1213_vm0, %v1115_v0  ;;  %v246_v2 = vshrl.u32 (!%p158_p3), %v245_v1, 7  ;;  %vm1442_vm2 = vcmask (!%p158_p3), 64512  }
   0xa   : > { %v247_v6 = vsub.s32 (!%p158_p3), 0, %v246_v2  ;;  %v347_v7 = vsub.s32 (!%p158_p3), 1, %v246_v2  ;;  %v447_v8 = vsub.s32 (!%p158_p3), 2, %v246_v2 }
   0xc   : > { %v1999_v9 = vrot.slane (!%p158_p3), %v210_v3, %v247_v6  ;;  %v2001_v10 = vrot.slane (!%p158_p3), %v210_v3, %v347_v7  ;;  %v2003_v11 = vrot.slane (!%p158_p3), %v210_v3, %v447_v8  ;;  %v2005_v12 = vrot.slane (!%p158_p3), %v211_v4, %v247_v6 }
   0xd   : > { %v2010_v16 = vrot.slane (!%p158_p3), %v211_v4, %v347_v7  ;;  %v2012_v17 = vrot.slane (!%p158_p3), %v211_v4, %v447_v8  ;;  %v2014_v18 = vrot.slane (!%p158_p3), %v212_v5, %v247_v6  ;;  %v2016_v19 = vrot.slane (!%p158_p3), %v212_v5, %v347_v7 }
   0xe   : > { %s2984_s12 = smov (!%p190_p4, %s1931_s12), 1  ;;  %v2022_v24 = vrot.slane %v212_v5, %v447_v8 }
   0xf   : > { %s1892_s22 = smul.u32 432, %s2984_s12  ;;  %s1806_s28 = sshll.u32 %s2984_s12, 8 }
  0x10   : > { %s2900_s4 = scalar_lea.vmem %s2978_s3, %s1806_s28 }
  0x11   : > { %s1997_s27 = scalar_lea.vmem %s2975_s0, %s1892_s22 }
  0x12   : > { %v213_v13 = vld [vmem:[%s1997_s27] sm:$0xff]  ;;  %v1579_v23 = vld [vmem:[%s1997_s27 + $0x18] sm:$0xff]  ;;  %v2029_v27 = vld [vmem:[%s1997_s27 + $0x30] sm:$0xff] }
  0x13   : > { %v313_v14 = vld [vmem:[%s1997_s27 + $0x1] sm:$0xff]  ;;  %v249_v20 = vmul.f32 %v1999_v9, %v213_v13  ;;  %v1611_v25 = vld [vmem:[%s1997_s27 + $0x19] sm:$0xff]  ;;  %v550_v29 = vmul.f32 %v1579_v23, %v2005_v12  ;;  %v2039_v35 = vld [vmem:[%s1997_s27 + $0x31] sm:$0xff]  ;;  %v251_v41 = vmul.f32 %v1579_v23, %v1999_v9  ;;  %v851_v43 = vmul.f32 %v2029_v27, %v2014_v18 }
  0x14   : > { %v413_v15 = vld [vmem:[%s1997_s27 + $0x2] sm:$0xff]  ;;  %v349_v21 = vmul.f32 %v2001_v10, %v313_v14  ;;  %v2026_v26 = vld [vmem:[%s1997_s27 + $0x1a] sm:$0xff]  ;;  %v650_v30 = vmul.f32 %v1611_v25, %v2010_v16  ;;  %v2042_v36 = vld [vmem:[%s1997_s27 + $0x32] sm:$0xff]  ;;  %v951_v44 = vmul.f32 %v2039_v35, %v2016_v19  ;;  %v351_v54 = vmul.f32 %v1611_v25, %v2001_v10 }
  0x15   : > { %v449_v22 = vmul.f32 %v2003_v11, %v413_v15  ;;  %v750_v31 = vmul.f32 %v2026_v26, %v2012_v17  ;;  %v229_v32 = vld [vmem:[%s1997_s27 + $0xc0] sm:$0xff]  ;;  %v2048_v40 = vld [vmem:[%s1997_s27 + $0xd8] sm:$0xff]  ;;  %v2057_v45 = vmul.f32 %v2042_v36, %v2022_v24  ;;  %v214_v51 = vld [vmem:[%s1997_s27 + $0x8] sm:$0xff] }
  0x16   : > { %v381_v28 = vadd.f32 %v349_v21, %v249_v20  ;;  %v329_v33 = vld [vmem:[%s1997_s27 + $0xc1] sm:$0xff]  ;;  %v265_v37 = vmul.f32 %v1999_v9, %v229_v32  ;;  %v2060_v46 = vld [vmem:[%s1997_s27 + $0xd9] sm:$0xff]  ;;  %v566_v49 = vmul.f32 %v2048_v40, %v2005_v12  ;;  %v314_v52 = vld [vmem:[%s1997_s27 + $0x9] sm:$0xff]  ;;  %v250_v58 = vmul.f32 %v1999_v9, %v214_v51 }
  0x17   : > { %v429_v34 = vld [vmem:[%s1997_s27 + $0xc2] sm:$0xff]  ;;  %v365_v38 = vmul.f32 %v2001_v10, %v329_v33  ;;  %v2063_v47 = vld [vmem:[%s1997_s27 + $0xda] sm:$0xff]  ;;  %v666_v50 = vmul.f32 %v2060_v46, %v2010_v16  ;;  %v414_v53 = vld [vmem:[%s1997_s27 + $0xa] sm:$0xff]  ;;  %v350_v59 = vmul.f32 %v2001_v10, %v314_v52 }
  0x18   : > { %v465_v39 = vmul.f32 %v2003_v11, %v429_v34  ;;  %v481_v42 = vadd.f32 %v449_v22, %v381_v28  ;;  %v2074_v56 = vld [vmem:[%s1997_s27 + $0xf0] sm:$0xff]  ;;  %v450_v60 = vmul.f32 %v2003_v11, %v414_v53  ;;  %v2083_v61 = vld [vmem:[%s1997_s27 + $0x20] sm:$0xff]  ;;  %v766_v63 = vmul.f32 %v2063_v47, %v2012_v17  ;;  %v230_v8 = vld [vmem:[%s1997_s27 + $0xc8] sm:$0xff] }
  0x19   : > { %v397_v48 = vadd.f32 %v365_v38, %v265_v37  ;;  %v2077_v57 = vld [vmem:[%s1997_s27 + $0xf1] sm:$0xff]  ;;  %v867_v0 = vmul.f32 %v2074_v56, %v2014_v18  ;;  %v2095_v3 = vld [vmem:[%s1997_s27 + $0x21] sm:$0xff]  ;;  %v382_v6 = vadd.f32 %v350_v59, %v250_v58  ;;  %v551_v7 = vmul.f32 %v2083_v61, %v2005_v12  ;;  %v330_v13 = vld [vmem:[%s1997_s27 + $0xc9] sm:$0xff] }
  0x1a   : > { %v582_v55 = vadd.f32 %v550_v29, %v481_v42  ;;  %v967_v1 = vmul.f32 %v2077_v57, %v2016_v19  ;;  %v2092_v2 = vld [vmem:[%s1997_s27 + $0xf2] sm:$0xff]  ;;  %v430_v14 = vld [vmem:[%s1997_s27 + $0xca] sm:$0xff]  ;;  %v651_v20 = vmul.f32 %v2095_v3, %v2010_v16  ;;  %v2107_v21 = vld [vmem:[%s1997_s27 + $0x22] sm:$0xff]  ;;  %v266_v22 = vmul.f32 %v1999_v9, %v230_v8 }
  0x1b   : > { %v497_v62 = vadd.f32 %v465_v39, %v397_v48  ;;  %v1067_v5 = vmul.f32 %v2092_v2, %v2022_v24  ;;  %v366_v23 = vmul.f32 %v2001_v10, %v330_v13  ;;  %v2112_v25 = vld [vmem:[%s1997_s27 + $0xe0] sm:$0xff]  ;;  %v482_v29 = vadd.f32 %v450_v60, %v382_v6  ;;  %v2117_v32 = vld [vmem:[%s1997_s27 + $0x38] sm:$0xff] }
  0x1c   : > { %v682_v4 = vadd.f32 %v650_v30, %v582_v55  ;;  %v751_v30 = vmul.f32 %v2107_v21, %v2012_v17  ;;  %v466_v33 = vmul.f32 %v2003_v11, %v430_v14  ;;  %v852_v37 = vmul.f32 %v2117_v32, %v2014_v18  ;;  %v2123_v38 = vld [vmem:[%s1997_s27 + $0x39] sm:$0xff]  ;;  %v2135_v52 = vld [vmem:[%s1997_s27 + $0xe1] sm:$0xff] }
  0x1d   : > { %v598_v15 = vadd.f32 %v566_v49, %v497_v62  ;;  %v2126_v39 = vld [vmem:[%s1997_s27 + $0x3a] sm:$0xff]  ;;  %v398_v42 = vadd.f32 %v366_v23, %v266_v22  ;;  %v583_v49 = vadd.f32 %v551_v7, %v482_v29  ;;  %v952_v51 = vmul.f32 %v2123_v38, %v2016_v19  ;;  %v2165_v29 = vld [vmem:[%s1997_s27 + $0x48] sm:$0xff] }
  0x1e   : > { %v782_v28 = vadd.f32 %v750_v31, %v682_v4  ;;  %v567_v31 = vmul.f32 %v2112_v25, %v2005_v12  ;;  %v667_v58 = vmul.f32 %v2135_v52, %v2010_v16  ;;  %v383_v59 = vadd.f32 %v351_v54, %v251_v41  ;;  %v2140_v4 = vld [vmem:[%s1997_s27 + $0xe2] sm:$0xff]  ;;  %v2155_v14 = vld [vmem:[%s1997_s27 + $0xf9] sm:$0xff] }
  0x1f   : > { %v698_v34 = vadd.f32 %v666_v50, %v598_v15  ;;  %v1052_v50 = vmul.f32 %v2126_v39, %v2022_v24  ;;  %v498_v55 = vadd.f32 %v466_v33, %v398_v42  ;;  %v683_v62 = vadd.f32 %v651_v20, %v583_v49 }
  0x20   : > { %v883_v48 = vadd.f32 %v851_v43, %v782_v28  ;;  %v2143_v43 = vld [vmem:[%s1997_s27 + $0xf8] sm:$0xff]  ;;  %v451_v6 = vmul.f32 %v2026_v26, %v2003_v11  ;;  %v552_v7 = vmul.f32 %v2029_v27, %v2005_v12  ;;  %v767_v13 = vmul.f32 %v2140_v4, %v2012_v17 }
  0x21   : > { %v798_v53 = vadd.f32 %v766_v63, %v698_v34  ;;  %v599_v63 = vadd.f32 %v567_v31, %v498_v55  ;;  %v868_v41 = vmul.f32 %v2143_v43, %v2014_v18  ;;  %v783_v54 = vadd.f32 %v751_v30, %v683_v62 }
  0x22   : > { %v983_v60 = vadd.f32 %v951_v44, %v883_v48  ;;  %v483_v15 = vadd.f32 %v451_v6, %v383_v59  ;;  %v652_v26 = vmul.f32 %v2039_v35, %v2010_v16  ;;  %v968_v22 = vmul.f32 %v2155_v14, %v2016_v19  ;;  %v2191_v6 = vld [vmem:[%s1997_s27 + $0x4a] sm:$0xff] }
  0x23   : > { %v899_v8 = vadd.f32 %v867_v0, %v798_v53  ;;  %v699_v0 = vadd.f32 %v667_v58, %v599_v63  ;;  %v752_v23 = vmul.f32 %v2042_v36, %v2012_v17  ;;  %v267_v30 = vmul.f32 %v2048_v40, %v1999_v9  ;;  %v2179_v53 = vld [vmem:[%s1997_s27 + $0x49] sm:$0xff] }
  0x24   : > { %v1083_v44 = vadd.f32 %v2057_v45, %v983_v60  ;;  %v884_v45 = vadd.f32 %v852_v37, %v783_v54  ;;  %v584_v28 = vadd.f32 %v552_v7, %v483_v15  ;;  %v853_v42 = vmul.f32 %v2165_v29, %v2014_v18  ;;  %v2176_v37 = vld [vmem:[%s1997_s27 + $0xfa] sm:$0xff] }
  0x25   : > { %v999_v20 = vadd.f32 %v967_v1, %v899_v8  ;;  %v367_v1 = vmul.f32 %v2060_v46, %v2001_v10  ;;  %v799_v34 = vadd.f32 %v767_v13, %v699_v0  ;;  %v467_v31 = vmul.f32 %v2063_v47, %v2003_v11 }
  0x26   : > { %1842 = vmatprep.mubr.msk.f32.mxu0 %vm1116_vm1, %v1083_v44  ;;  %v984_v48 = vadd.f32 %v952_v51, %v884_v45  ;;  %v684_v49 = vadd.f32 %v652_v26, %v584_v28  ;;  %v568_v40 = vmul.f32 %v2074_v56, %v2005_v12  ;;  %v953_v47 = vmul.f32 %v2179_v53, %v2016_v19 }
  0x27   : > { %v1099_v33 = vadd.f32 %v1067_v5, %v999_v20  ;;  %v399_v55 = vadd.f32 %v367_v1, %v267_v30  ;;  %v900_v46 = vadd.f32 %v868_v41, %v799_v34  ;;  %v1068_v5 = vmul.f32 %v2176_v37, %v2022_v24 }
  0x28   : > { %v1084_v51 = vadd.f32 %v1052_v50, %v984_v48  ;;  %v784_v58 = vadd.f32 %v752_v23, %v684_v49  ;;  %v668_v60 = vmul.f32 %v2077_v57, %v2010_v16  ;;  %v252_v7 = vmul.f32 %v2083_v61, %v1999_v9  ;;  %v2205_v61 = vld [vmem:[%s1997_s27 + $0x108] sm:$0xff]  ;;  %v2233_v49 = vld [vmem:[%s1997_s27 + $0x50] sm:$0xff] }
  0x29   : > { %1866 = vmatprep.mubr.msk.f32.mxu1 %vm1116_vm1, %v1099_v33  ;;  %v499_v59 = vadd.f32 %v467_v31, %v399_v55  ;;  %v1000_v62 = vadd.f32 %v968_v22, %v900_v46  ;;  %v352_v8 = vmul.f32 %v2095_v3, %v2001_v10  ;;  %v452_v63 = vmul.f32 %v2107_v21, %v2003_v11  ;;  %v2215_v22 = vld [vmem:[%s1997_s27 + $0x109] sm:$0xff] }
  0x2a   : > { %1843 = vmatmul.mubr.msk.f32.vlgmr.msra.gmra.mrb[0].mxu0 %vm1116_vm1, %v1084_v51  ;;  %v885_v50 = vadd.f32 %v853_v42, %v784_v58  ;;  %v1053_v13 = vmul.f32 %v2191_v6, %v2022_v24  ;;  %v768_v44 = vmul.f32 %v2092_v2, %v2012_v17  ;;  %v553_v3 = vmul.f32 %v2117_v32, %v2005_v12  ;;  %v2218_v23 = vld [vmem:[%s1997_s27 + $0x10a] sm:$0xff]  ;;  %v2248_v58 = vld [vmem:[%s1997_s27 + $0x52] sm:$0xff] }
  0x2b   : > { %v600_v41 = vadd.f32 %v568_v40, %v499_v59  ;;  %v1100_v54 = vadd.f32 %v1068_v5, %v1000_v62  ;;  %v384_v15 = vadd.f32 %v352_v8, %v252_v7  ;;  %v869_v20 = vmul.f32 %v2205_v61, %v2014_v18  ;;  %v2245_v51 = vld [vmem:[%s1997_s27 + $0x51] sm:$0xff] }
  0x2c   : > { %v985_v26 = vadd.f32 %v953_v47, %v885_v50  ;;  %v653_v0 = vmul.f32 %v2123_v38, %v2010_v16  ;;  %v268_v28 = vmul.f32 %v2112_v25, %v1999_v9  ;;  %v368_v30 = vmul.f32 %v2135_v52, %v2001_v10 }
  0x2d   : > { %v700_v21 = vadd.f32 %v668_v60, %v600_v41  ;;  %1867 = vmatmul.mubr.msk.f32.vlgmr.msra.gmra.mrb[0].mxu1 %vm1116_vm1, %v1100_v54  ;;  %v484_v45 = vadd.f32 %v452_v63, %v384_v15  ;;  %v468_v1 = vmul.f32 %v2140_v4, %v2003_v11  ;;  %v969_v42 = vmul.f32 %v2215_v22, %v2016_v19  ;;  %v2261_v41 = vld [vmem:[%s1997_s27 + $0x110] sm:$0xff] }
  0x2e   : > { %v1085_v33 = vadd.f32 %v1053_v13, %v985_v26  ;;  %v1069_v31 = vmul.f32 %v2218_v23, %v2022_v24  ;;  %v753_v25 = vmul.f32 %v2126_v39, %v2012_v17  ;;  %v400_v52 = vadd.f32 %v368_v30, %v268_v28 }
  0x2f   : > { %v800_v34 = vadd.f32 %v768_v44, %v700_v21  ;;  %v585_v48 = vadd.f32 %v553_v3, %v484_v45  ;;  %v569_v4 = vmul.f32 %v2143_v43, %v2005_v12  ;;  %v854_v40 = vmul.f32 %v2233_v49, %v2014_v18 }
  0x30   : > { %1845 = vmatprep.mubr.msk.f32.mxu0 %vm1116_vm1, %v1085_v33  ;;  %v669_v46 = vmul.f32 %v2155_v14, %v2010_v16  ;;  %v253_v5 = vmul.f32 %v2029_v27, %v1999_v9  ;;  %v500_v59 = vadd.f32 %v468_v1, %v400_v52  ;;  %v353_v60 = vmul.f32 %v2039_v35, %v2001_v10 }
  0x31   : > { %v901_v55 = vadd.f32 %v869_v20, %v800_v34  ;;  %v685_v47 = vadd.f32 %v653_v0, %v585_v48  ;;  %v453_v62 = vmul.f32 %v2042_v36, %v2003_v11  ;;  %v954_v8 = vmul.f32 %v2245_v51, %v2016_v19  ;;  %v2272_v20 = vld [vmem:[%s1997_s27 + $0x111] sm:$0xff] }
  0x32   : > { %v1054_v27 = vmul.f32 %v2248_v58, %v2022_v24  ;;  %v769_v63 = vmul.f32 %v2176_v37, %v2012_v17  ;;  %v601_v13 = vadd.f32 %v569_v4, %v500_v59  ;;  %v385_v44 = vadd.f32 %v353_v60, %v253_v5  ;;  %v2300_v5 = vld [vmem:[%s1997_s27 + $0x61] sm:$0xff] }
  0x33   : > { %v1001_v7 = vadd.f32 %v969_v42, %v901_v55  ;;  %v785_v50 = vadd.f32 %v753_v25, %v685_v47  ;;  %v554_v35 = vmul.f32 %v2165_v29, %v2005_v12  ;;  %v870_v54 = vmul.f32 %v2261_v41, %v2014_v18  ;;  %v2286_v42 = vld [vmem:[%s1997_s27 + $0x112] sm:$0xff]  ;;  %v2303_v47 = vld [vmem:[%s1997_s27 + $0x62] sm:$0xff] }
  0x34   : > { %v654_v15 = vmul.f32 %v2179_v53, %v2010_v16  ;;  %v269_v3 = vmul.f32 %v2074_v56, %v1999_v9  ;;  %v701_v21 = vadd.f32 %v669_v46, %v601_v13  ;;  %v485_v0 = vadd.f32 %v453_v62, %v385_v44  ;;  %v2317_v13 = vld [vmem:[%s1997_s27 + $0x120] sm:$0xff] }
  0x35   : > { %v1101_v36 = vadd.f32 %v1069_v31, %v1001_v7  ;;  %v886_v26 = vadd.f32 %v854_v40, %v785_v50  ;;  %v369_v45 = vmul.f32 %v2077_v57, %v2001_v10  ;;  %v970_v28 = vmul.f32 %v2272_v20, %v2016_v19  ;;  %v2289_v31 = vld [vmem:[%s1997_s27 + $0x60] sm:$0xff] }
  0x36   : > { %v754_v30 = vmul.f32 %v2191_v6, %v2012_v17  ;;  %v469_v56 = vmul.f32 %v2092_v2, %v2003_v11  ;;  %v570_v1 = vmul.f32 %v2205_v61, %v2005_v12  ;;  %v801_v34 = vadd.f32 %v769_v63, %v701_v21  ;;  %v2320_v44 = vld [vmem:[%s1997_s27 + $0x121] sm:$0xff] }
  0x37   : > { %1869 = vmatprep.mubr.msk.f32.mxu1 %vm1116_vm1, %v1101_v36  ;;  %v986_v33 = vadd.f32 %v954_v8, %v886_v26  ;;  %v586_v57 = vadd.f32 %v554_v35, %v485_v0  ;;  %v401_v48 = vadd.f32 %v369_v45, %v269_v3  ;;  %v1070_v25 = vmul.f32 %v2286_v42, %v2022_v24  ;;  %v2331_v21 = vld [vmem:[%s1997_s27 + $0x122] sm:$0xff] }
  0x38   : > { %v855_v52 = vmul.f32 %v2289_v31, %v2014_v18  ;;  %v670_v2 = vmul.f32 %v2215_v22, %v2010_v16  ;;  %v254_v4 = vmul.f32 %v2117_v32, %v1999_v9  ;;  %v902_v40 = vadd.f32 %v870_v54, %v801_v34  ;;  %v2345_v34 = vld [vmem:[%s1997_s27 + $0x68] sm:$0xff] }
  0x39   : > { %v1086_v55 = vadd.f32 %v1054_v27, %v986_v33  ;;  %v686_v46 = vadd.f32 %v654_v15, %v586_v57  ;;  %v501_v59 = vadd.f32 %v469_v56, %v401_v48  ;;  %v955_v60 = vmul.f32 %v2300_v5, %v2016_v19 }
  0x3a   : > { %v1055_v62 = vmul.f32 %v2303_v47, %v2022_v24  ;;  %v354_v7 = vmul.f32 %v2123_v38, %v2001_v10  ;;  %v454_v32 = vmul.f32 %v2126_v39, %v2003_v11  ;;  %v1002_v8 = vadd.f32 %v970_v28, %v902_v40  ;;  %v2356_v40 = vld [vmem:[%s1997_s27 + $0x69] sm:$0xff] }
  0x3b   : > { %1846 = vmatmul.mubr.msk.f32.gmra.mrb[2].mxu0 %vm1116_vm1, %v1086_v55  ;;  %v786_v27 = vadd.f32 %v754_v30, %v686_v46  ;;  %v602_v63 = vadd.f32 %v570_v1, %v501_v59  ;;  %v770_v50 = vmul.f32 %v2218_v23, %v2012_v17  ;;  %v871_v35 = vmul.f32 %v2317_v13, %v2014_v18  ;;  %v2359_v46 = vld [vmem:[%s1997_s27 + $0x6a] sm:$0xff] }
  0x3c   : > { %v971_v38 = vmul.f32 %v2320_v44, %v2016_v19  ;;  %v386_v39 = vadd.f32 %v354_v7, %v254_v4  ;;  %v555_v36 = vmul.f32 %v2233_v49, %v2005_v12  ;;  %v1102_v54 = vadd.f32 %v1070_v25, %v1002_v8 }
  0x3d   : > { %v887_v15 = vadd.f32 %v855_v52, %v786_v27  ;;  %v702_v3 = vadd.f32 %v670_v2, %v602_v63  ;;  %v270_v26 = vmul.f32 %v2143_v43, %v1999_v9  ;;  %v655_v45 = vmul.f32 %v2245_v51, %v2010_v16 }
  0x3e   : > { %v486_v0 = vadd.f32 %v454_v32, %v386_v39  ;;  %v370_v28 = vmul.f32 %v2155_v14, %v2001_v10  ;;  %v470_v30 = vmul.f32 %v2176_v37, %v2003_v11  ;;  %1870 = vmatmul.mubr.msk.f32.gmra.mrb[2].mxu1 %vm1116_vm1, %v1102_v54  ;;  %v1071_v43 = vmul.f32 %v2331_v21, %v2022_v24 }
  0x3f   : > { %v987_v56 = vadd.f32 %v955_v60, %v887_v15  ;;  %v802_v1 = vadd.f32 %v770_v50, %v702_v3  ;;  %v755_v33 = vmul.f32 %v2248_v58, %v2012_v17  ;;  %v856_v14 = vmul.f32 %v2345_v34, %v2014_v18  ;;  %v2373_v50 = vld [vmem:[%s1997_s27 + $0x128] sm:$0xff] }
  0x40   : > { %v587_v57 = vadd.f32 %v555_v36, %v486_v0  ;;  %v402_v48 = vadd.f32 %v370_v28, %v270_v26  ;;  %v571_v37 = vmul.f32 %v2261_v41, %v2005_v12  ;;  %v671_v2 = vmul.f32 %v2272_v20, %v2010_v16  ;;  %v2384_v3 = vld [vmem:[%s1997_s27 + $0x129] sm:$0xff] }
  0x41   : > { %v1087_v25 = vadd.f32 %v1055_v62, %v987_v56  ;;  %v903_v52 = vadd.f32 %v871_v35, %v802_v1  ;;  %v255_v4 = vmul.f32 %v2165_v29, %v1999_v9  ;;  %v355_v60 = vmul.f32 %v2179_v53, %v2001_v10 }
  0x42   : > { %v687_v55 = vadd.f32 %v655_v45, %v587_v57  ;;  %v502_v59 = vadd.f32 %v470_v30, %v402_v48  ;;  %v455_v62 = vmul.f32 %v2191_v6, %v2003_v11  ;;  %v956_v32 = vmul.f32 %v2356_v40, %v2016_v19 }
  0x43   : > { %1848 = vmatprep.mubr.msk.f32.mxu0 %vm1116_vm1, %v1087_v25  ;;  %v1003_v7 = vadd.f32 %v971_v38, %v903_v52  ;;  %v1056_v29 = vmul.f32 %v2359_v46, %v2022_v24  ;;  %v771_v8 = vmul.f32 %v2286_v42, %v2012_v17  ;;  %v387_v53 = vadd.f32 %v355_v60, %v255_v4  ;;  %v2412_v4 = vld [vmem:[%s1997_s27 + $0x79] sm:$0xff] }
  0x44   : > { %v787_v27 = vadd.f32 %v755_v33, %v687_v55  ;;  %v603_v63 = vadd.f32 %v571_v37, %v502_v59  ;;  %v556_v6 = vmul.f32 %v2289_v31, %v2005_v12  ;;  %v872_v38 = vmul.f32 %v2373_v50, %v2014_v18  ;;  %v2401_v33 = vld [vmem:[%s1997_s27 + $0x78] sm:$0xff] }
  0x45   : > { %v1103_v35 = vadd.f32 %v1071_v43, %v1003_v7  ;;  %v656_v39 = vmul.f32 %v2300_v5, %v2010_v16  ;;  %v271_v36 = vmul.f32 %v2205_v61, %v1999_v9  ;;  %v487_v26 = vadd.f32 %v455_v62, %v387_v53  ;;  %v2398_v43 = vld [vmem:[%s1997_s27 + $0x12a] sm:$0xff]  ;;  %v2415_v55 = vld [vmem:[%s1997_s27 + $0x7a] sm:$0xff] }
  0x46   : > { %v888_v54 = vadd.f32 %v856_v14, %v787_v27  ;;  %v703_v15 = vadd.f32 %v671_v2, %v603_v63  ;;  %v371_v0 = vmul.f32 %v2215_v22, %v2001_v10  ;;  %v972_v45 = vmul.f32 %v2384_v3, %v2016_v19  ;;  %v2429_v63 = vld [vmem:[%s1997_s27 + $0x138] sm:$0xff] }
  0x47   : > { %1872 = vmatprep.mubr.msk.f32.mxu1 %vm1116_vm1, %v1103_v35  ;;  %v756_v28 = vmul.f32 %v2303_v47, %v2012_v17  ;;  %v471_v61 = vmul.f32 %v2218_v23, %v2003_v11  ;;  %v572_v30 = vmul.f32 %v2317_v13, %v2005_v12  ;;  %v588_v22 = vadd.f32 %v556_v6, %v487_v26  ;;  %v2432_v53 = vld [vmem:[%s1997_s27 + $0x139] sm:$0xff] }
  0x48   : > { %v988_v56 = vadd.f32 %v956_v32, %v888_v54  ;;  %v803_v1 = vadd.f32 %v771_v8, %v703_v15  ;;  %v403_v57 = vadd.f32 %v371_v0, %v271_v36  ;;  %v1072_v14 = vmul.f32 %v2398_v43, %v2022_v24  ;;  %v2443_v15 = vld [vmem:[%s1997_s27 + $0x13a] sm:$0xff] }
  0x49   : > { %v857_v48 = vmul.f32 %v2401_v33, %v2014_v18  ;;  %v672_v23 = vmul.f32 %v2320_v44, %v2010_v16  ;;  %v256_v37 = vmul.f32 %v2233_v49, %v1999_v9  ;;  %v688_v2 = vadd.f32 %v656_v39, %v588_v22 }
  0x4a   : > { %v1088_v25 = vadd.f32 %v1056_v29, %v988_v56  ;;  %v904_v52 = vadd.f32 %v872_v38, %v803_v1  ;;  %v503_v59 = vadd.f32 %v471_v61, %v403_v57  ;;  %v957_v60 = vmul.f32 %v2412_v4, %v2016_v19  ;;  %v2457_v1 = vld [vmem:[%s1997_s27 + $0x80] sm:$0xff] }
  0x4b   : > { %v1057_v62 = vmul.f32 %v2415_v55, %v2022_v24  ;;  %v356_v7 = vmul.f32 %v2245_v51, %v2001_v10  ;;  %v456_v49 = vmul.f32 %v2248_v58, %v2003_v11  ;;  %v788_v29 = vadd.f32 %v756_v28, %v688_v2  ;;  %v2471_v2 = vld [vmem:[%s1997_s27 + $0x82] sm:$0xff] }
  0x4c   : > { %1849 = vmatmul.mubr.msk.f32.gmra.mrb[4].mxu0 %vm1116_vm1, %v1088_v25  ;;  %v1004_v32 = vadd.f32 %v972_v45, %v904_v52  ;;  %v604_v8 = vadd.f32 %v572_v30, %v503_v59  ;;  %v772_v27 = vmul.f32 %v2331_v21, %v2012_v17  ;;  %v873_v6 = vmul.f32 %v2429_v63, %v2014_v18  ;;  %v2468_v52 = vld [vmem:[%s1997_s27 + $0x81] sm:$0xff] }
  0x4d   : > { %v973_v51 = vmul.f32 %v2432_v53, %v2016_v19  ;;  %v388_v58 = vadd.f32 %v356_v7, %v256_v37  ;;  %v557_v35 = vmul.f32 %v2345_v34, %v2005_v12  ;;  %v889_v39 = vadd.f32 %v857_v48, %v788_v29 }
  0x4e   : > { %v1104_v38 = vadd.f32 %v1072_v14, %v1004_v32  ;;  %v704_v36 = vadd.f32 %v672_v23, %v604_v8  ;;  %v272_v54 = vmul.f32 %v2261_v41, %v1999_v9  ;;  %v657_v0 = vmul.f32 %v2356_v40, %v2010_v16 }
  0x4f   : > { %v488_v26 = vadd.f32 %v456_v49, %v388_v58  ;;  %v372_v45 = vmul.f32 %v2272_v20, %v2001_v10  ;;  %v472_v28 = vmul.f32 %v2286_v42, %v2003_v11  ;;  %v989_v61 = vadd.f32 %v957_v60, %v889_v39 }
  0x50   : > { %1873 = vmatmul.mubr.msk.f32.gmra.mrb[4].mxu1 %vm1116_vm1, %v1104_v38  ;;  %v804_v30 = vadd.f32 %v772_v27, %v704_v36  ;;  %v1073_v41 = vmul.f32 %v2443_v15, %v2022_v24  ;;  %v757_v56 = vmul.f32 %v2359_v46, %v2012_v17  ;;  %v858_v20 = vmul.f32 %v2457_v1, %v2014_v18  ;;  %v2485_v27 = vld [vmem:[%s1997_s27 + $0x140] sm:$0xff] }
  0x51   : > { %v589_v22 = vadd.f32 %v557_v35, %v488_v26  ;;  %v404_v57 = vadd.f32 %v372_v45, %v272_v54  ;;  %v573_v42 = vmul.f32 %v2373_v50, %v2005_v12  ;;  %v1089_v14 = vadd.f32 %v1057_v62, %v989_v61  ;;  %v2496_v36 = vld [vmem:[%s1997_s27 + $0x141] sm:$0xff] }
  0x52   : > { %v905_v48 = vadd.f32 %v873_v6, %v804_v30  ;;  %v673_v23 = vmul.f32 %v2384_v3, %v2010_v16  ;;  %v257_v37 = vmul.f32 %v2289_v31, %v1999_v9  ;;  %v357_v60 = vmul.f32 %v2300_v5, %v2001_v10 }
  0x53   : > { %v689_v25 = vadd.f32 %v657_v0, %v589_v22  ;;  %v504_v59 = vadd.f32 %v472_v28, %v404_v57  ;;  %v457_v62 = vmul.f32 %v2303_v47, %v2003_v11  ;;  %1851 = vmatprep.mubr.msk.f32.mxu0 %vm1116_vm1, %v1089_v14  ;;  %v958_v49 = vmul.f32 %v2468_v52, %v2016_v19 }
  0x54   : > { %v1005_v7 = vadd.f32 %v973_v51, %v905_v48  ;;  %v1058_v31 = vmul.f32 %v2471_v2, %v2022_v24  ;;  %v773_v32 = vmul.f32 %v2398_v43, %v2012_v17  ;;  %v389_v5 = vadd.f32 %v357_v60, %v257_v37  ;;  %v2524_v37 = vld [vmem:[%s1997_s27 + $0x91] sm:$0xff] }
  0x55   : > { %v789_v29 = vadd.f32 %v757_v56, %v689_v25  ;;  %v605_v8 = vadd.f32 %v573_v42, %v504_v59  ;;  %v558_v47 = vmul.f32 %v2401_v33, %v2005_v12  ;;  %v874_v51 = vmul.f32 %v2485_v27, %v2014_v18  ;;  %v2513_v56 = vld [vmem:[%s1997_s27 + $0x90] sm:$0xff] }
  0x56   : > { %v1105_v6 = vadd.f32 %v1073_v41, %v1005_v7  ;;  %v658_v58 = vmul.f32 %v2412_v4, %v2010_v16  ;;  %v273_v35 = vmul.f32 %v2317_v13, %v1999_v9  ;;  %v489_v54 = vadd.f32 %v457_v62, %v389_v5  ;;  %v2510_v41 = vld [vmem:[%s1997_s27 + $0x142] sm:$0xff]  ;;  %v2527_v25 = vld [vmem:[%s1997_s27 + $0x92] sm:$0xff] }
  0x57   : > { %v890_v38 = vadd.f32 %v858_v20, %v789_v29  ;;  %v705_v39 = vadd.f32 %v673_v23, %v605_v8  ;;  %v373_v26 = vmul.f32 %v2320_v44, %v2001_v10  ;;  %v974_v0 = vmul.f32 %v2496_v36, %v2016_v19  ;;  %v2541_v8 = vld [vmem:[%s1997_s27 + $0x150] sm:$0xff] }
  0x58   : > { %1875 = vmatprep.mubr.msk.f32.mxu1 %vm1116_vm1, %v1105_v6  ;;  %v758_v45 = vmul.f32 %v2415_v55, %v2012_v17  ;;  %v473_v13 = vmul.f32 %v2331_v21, %v2003_v11  ;;  %v574_v28 = vmul.f32 %v2429_v63, %v2005_v12  ;;  %v590_v44 = vadd.f32 %v558_v47, %v489_v54  ;;  %v2544_v5 = vld [vmem:[%s1997_s27 + $0x151] sm:$0xff] }
  0x59   : > { %v990_v61 = vadd.f32 %v958_v49, %v890_v38  ;;  %v805_v30 = vadd.f32 %v773_v32, %v705_v39  ;;  %v405_v22 = vadd.f32 %v373_v26, %v273_v35  ;;  %v1074_v20 = vmul.f32 %v2510_v41, %v2022_v24  ;;  %v2555_v39 = vld [vmem:[%s1997_s27 + $0x152] sm:$0xff] }
  0x5a   : > { %v859_v57 = vmul.f32 %v2513_v56, %v2014_v18  ;;  %v674_v21 = vmul.f32 %v2432_v53, %v2010_v16  ;;  %v258_v42 = vmul.f32 %v2345_v34, %v1999_v9  ;;  %v690_v23 = vadd.f32 %v658_v58, %v590_v44 }
  0x5b   : > { %v1090_v14 = vadd.f32 %v1058_v31, %v990_v61  ;;  %v906_v48 = vadd.f32 %v874_v51, %v805_v30  ;;  %v505_v59 = vadd.f32 %v473_v13, %v405_v22  ;;  %v959_v60 = vmul.f32 %v2524_v37, %v2016_v19  ;;  %v2569_v30 = vld [vmem:[%s1997_s27 + $0x98] sm:$0xff] }
  0x5c   : > { %v1059_v62 = vmul.f32 %v2527_v25, %v2022_v24  ;;  %v358_v7 = vmul.f32 %v2356_v40, %v2001_v10  ;;  %v458_v34 = vmul.f32 %v2359_v46, %v2003_v11  ;;  %v790_v31 = vadd.f32 %v758_v45, %v690_v23  ;;  %v2583_v23 = vld [vmem:[%s1997_s27 + $0x9a] sm:$0xff] }
  0x5d   : > { %1852 = vmatmul.mubr.msk.f32.gmra.mrb[6].mxu0 %vm1116_vm1, %v1090_v14  ;;  %v1006_v49 = vadd.f32 %v974_v0, %v906_v48  ;;  %v606_v32 = vadd.f32 %v574_v28, %v505_v59  ;;  %v774_v29 = vmul.f32 %v2443_v15, %v2012_v17  ;;  %v875_v47 = vmul.f32 %v2541_v8, %v2014_v18  ;;  %v2580_v48 = vld [vmem:[%s1997_s27 + $0x99] sm:$0xff] }
  0x5e   : > { %v975_v40 = vmul.f32 %v2544_v5, %v2016_v19  ;;  %v390_v46 = vadd.f32 %v358_v7, %v258_v42  ;;  %v559_v6 = vmul.f32 %v2457_v1, %v2005_v12  ;;  %v891_v58 = vadd.f32 %v859_v57, %v790_v31 }
  0x5f   : > { %v1106_v51 = vadd.f32 %v1074_v20, %v1006_v49  ;;  %v706_v35 = vadd.f32 %v674_v21, %v606_v32  ;;  %v274_v38 = vmul.f32 %v2373_v50, %v1999_v9  ;;  %v659_v26 = vmul.f32 %v2468_v52, %v2010_v16 }
  0x60   : > { %v490_v54 = vadd.f32 %v458_v34, %v390_v46  ;;  %v374_v0 = vmul.f32 %v2384_v3, %v2001_v10  ;;  %v474_v45 = vmul.f32 %v2398_v43, %v2003_v11  ;;  %v991_v13 = vadd.f32 %v959_v60, %v891_v58 }
  0x61   : > { %1876 = vmatmul.mubr.msk.f32.gmra.mrb[6].mxu1 %vm1116_vm1, %v1106_v51  ;;  %v806_v28 = vadd.f32 %v774_v29, %v706_v35  ;;  %v1075_v50 = vmul.f32 %v2555_v39, %v2022_v24  ;;  %v759_v61 = vmul.f32 %v2471_v2, %v2012_v17  ;;  %v860_v3 = vmul.f32 %v2569_v30, %v2014_v18  ;;  %v2597_v29 = vld [vmem:[%s1997_s27 + $0x158] sm:$0xff] }
  0x62   : > { %v591_v44 = vadd.f32 %v559_v6, %v490_v54  ;;  %v406_v22 = vadd.f32 %v374_v0, %v274_v38  ;;  %v575_v43 = vmul.f32 %v2485_v27, %v2005_v12  ;;  %v1091_v20 = vadd.f32 %v1059_v62, %v991_v13  ;;  %v2608_v35 = vld [vmem:[%s1997_s27 + $0x159] sm:$0xff] }
  0x63   : > { %v907_v57 = vadd.f32 %v875_v47, %v806_v28  ;;  %v675_v21 = vmul.f32 %v2496_v36, %v2010_v16  ;;  %v259_v42 = vmul.f32 %v2401_v33, %v1999_v9  ;;  %v359_v60 = vmul.f32 %v2412_v4, %v2001_v10 }
  0x64   : > { %v691_v14 = vadd.f32 %v659_v26, %v591_v44  ;;  %v506_v59 = vadd.f32 %v474_v45, %v406_v22  ;;  %v459_v62 = vmul.f32 %v2415_v55, %v2003_v11  ;;  %1854 = vmatprep.mubr.msk.f32.mxu0 %vm1116_vm1, %v1091_v20  ;;  %v960_v34 = vmul.f32 %v2580_v48, %v2016_v19 }
  0x65   : > { %v1007_v7 = vadd.f32 %v975_v40, %v907_v57  ;;  %v1060_v33 = vmul.f32 %v2583_v23, %v2022_v24  ;;  %v775_v49 = vmul.f32 %v2510_v41, %v2012_v17  ;;  %v391_v4 = vadd.f32 %v359_v60, %v259_v42  ;;  %v2636_v42 = vld [vmem:[%s1997_s27 + $0xa9] sm:$0xff] }
  0x66   : > { %v791_v31 = vadd.f32 %v759_v61, %v691_v14  ;;  %v607_v32 = vadd.f32 %v575_v43, %v506_v59  ;;  %v560_v55 = vmul.f32 %v2513_v56, %v2005_v12  ;;  %v876_v40 = vmul.f32 %v2597_v29, %v2014_v18  ;;  %v2625_v61 = vld [vmem:[%s1997_s27 + $0xa8] sm:$0xff] }
  0x67   : > { %v1107_v47 = vadd.f32 %v1075_v50, %v1007_v7  ;;  %v660_v46 = vmul.f32 %v2524_v37, %v2010_v16  ;;  %v275_v6 = vmul.f32 %v2429_v63, %v1999_v9  ;;  %v491_v38 = vadd.f32 %v459_v62, %v391_v4  ;;  %v2622_v50 = vld [vmem:[%s1997_s27 + $0x15a] sm:$0xff]  ;;  %v2639_v14 = vld [vmem:[%s1997_s27 + $0xaa] sm:$0xff] }
  0x68   : > { %v892_v51 = vadd.f32 %v860_v3, %v791_v31  ;;  %v707_v58 = vadd.f32 %v675_v21, %v607_v32  ;;  %v375_v54 = vmul.f32 %v2432_v53, %v2001_v10  ;;  %v976_v26 = vmul.f32 %v2608_v35, %v2016_v19  ;;  %v2653_v32 = vld [vmem:[%s1997_s27 + $0x168] sm:$0xff] }
  0x69   : > { %1878 = vmatprep.mubr.msk.f32.mxu1 %vm1116_vm1, %v1107_v47  ;;  %v760_v0 = vmul.f32 %v2527_v25, %v2012_v17  ;;  %v475_v63 = vmul.f32 %v2443_v15, %v2003_v11  ;;  %v576_v45 = vmul.f32 %v2541_v8, %v2005_v12  ;;  %v592_v53 = vadd.f32 %v560_v55, %v491_v38  ;;  %v2656_v4 = vld [vmem:[%s1997_s27 + $0x169] sm:$0xff] }
  0x6a   : > { %v992_v13 = vadd.f32 %v960_v34, %v892_v51  ;;  %v807_v28 = vadd.f32 %v775_v49, %v707_v58  ;;  %v407_v44 = vadd.f32 %v375_v54, %v275_v6  ;;  %v1076_v3 = vmul.f32 %v2622_v50, %v2022_v24  ;;  %v2667_v58 = vld [vmem:[%s1997_s27 + $0x16a] sm:$0xff] }
  0x6b   : > { %v861_v22 = vmul.f32 %v2625_v61, %v2014_v18  ;;  %v676_v15 = vmul.f32 %v2544_v5, %v2010_v16  ;;  %v260_v43 = vmul.f32 %v2457_v1, %v1999_v9  ;;  %v692_v21 = vadd.f32 %v660_v46, %v592_v53 }
  0x6c   : > { %v1092_v20 = vadd.f32 %v1060_v33, %v992_v13  ;;  %v908_v57 = vadd.f32 %v876_v40, %v807_v28  ;;  %v507_v59 = vadd.f32 %v475_v63, %v407_v44  ;;  %v961_v60 = vmul.f32 %v2636_v42, %v2016_v19  ;;  %v2681_v28 = vld [vmem:[%s1997_s27 + $0xb0] sm:$0xff] }
  0x6d   : > { %v1061_v62 = vmul.f32 %v2639_v14, %v2022_v24  ;;  %v360_v7 = vmul.f32 %v2468_v52, %v2001_v10  ;;  %v460_v1 = vmul.f32 %v2471_v2, %v2003_v11  ;;  %v792_v33 = vadd.f32 %v760_v0, %v692_v21  ;;  %v2695_v21 = vld [vmem:[%s1997_s27 + $0xb2] sm:$0xff] }
  0x6e   : > { %1855 = vmatmul.mubr.msk.f32.gmra.mrb[8].mxu0 %vm1116_vm1, %v1092_v20  ;;  %v1008_v34 = vadd.f32 %v976_v26, %v908_v57  ;;  %v608_v49 = vadd.f32 %v576_v45, %v507_v59  ;;  %v776_v31 = vmul.f32 %v2555_v39, %v2012_v17  ;;  %v877_v55 = vmul.f32 %v2653_v32, %v2014_v18  ;;  %v2692_v57 = vld [vmem:[%s1997_s27 + $0xb1] sm:$0xff] }
  0x6f   : > { %v977_v52 = vmul.f32 %v2656_v4, %v2016_v19  ;;  %v392_v2 = vadd.f32 %v360_v7, %v260_v43  ;;  %v561_v47 = vmul.f32 %v2569_v30, %v2005_v12  ;;  %v893_v46 = vadd.f32 %v861_v22, %v792_v33 }
  0x70   : > { %v1108_v40 = vadd.f32 %v1076_v3, %v1008_v34  ;;  %v708_v6 = vadd.f32 %v676_v15, %v608_v49  ;;  %v276_v51 = vmul.f32 %v2485_v27, %v1999_v9  ;;  %v661_v54 = vmul.f32 %v2580_v48, %v2010_v16 }
  0x71   : > { %v492_v38 = vadd.f32 %v460_v1, %v392_v2  ;;  %v376_v26 = vmul.f32 %v2496_v36, %v2001_v10  ;;  %v476_v0 = vmul.f32 %v2510_v41, %v2003_v11  ;;  %v993_v63 = vadd.f32 %v961_v60, %v893_v46 }
  0x72   : > { %1879 = vmatmul.mubr.msk.f32.gmra.mrb[8].mxu1 %vm1116_vm1, %v1108_v40  ;;  %v808_v45 = vadd.f32 %v776_v31, %v708_v6  ;;  %v1077_v27 = vmul.f32 %v2667_v58, %v2022_v24  ;;  %v761_v13 = vmul.f32 %v2583_v23, %v2012_v17  ;;  %v862_v36 = vmul.f32 %v2681_v28, %v2014_v18  ;;  %v2709_v31 = vld [vmem:[%s1997_s27 + $0x170] sm:$0xff] }
  0x73   : > { %v593_v53 = vadd.f32 %v561_v47, %v492_v38  ;;  %v408_v44 = vadd.f32 %v376_v26, %v276_v51  ;;  %v577_v41 = vmul.f32 %v2597_v29, %v2005_v12  ;;  %v1093_v3 = vadd.f32 %v1061_v62, %v993_v63  ;;  %v2720_v6 = vld [vmem:[%s1997_s27 + $0x171] sm:$0xff] }
  0x74   : > { %v909_v22 = vadd.f32 %v877_v55, %v808_v45  ;;  %v677_v15 = vmul.f32 %v2608_v35, %v2010_v16  ;;  %v261_v43 = vmul.f32 %v2513_v56, %v1999_v9  ;;  %v361_v60 = vmul.f32 %v2524_v37, %v2001_v10 }
  0x75   : > { %v693_v20 = vadd.f32 %v661_v54, %v593_v53  ;;  %v508_v59 = vadd.f32 %v476_v0, %v408_v44  ;;  %v461_v62 = vmul.f32 %v2527_v25, %v2003_v11  ;;  %1857 = vmatprep.mubr.msk.f32.mxu0 %vm1116_vm1, %v1093_v3  ;;  %v962_v1 = vmul.f32 %v2692_v57, %v2016_v19 }
  0x76   : > { %v1009_v7 = vadd.f32 %v977_v52, %v909_v22  ;;  %v1062_v56 = vmul.f32 %v2695_v21, %v2022_v24  ;;  %v777_v34 = vmul.f32 %v2622_v50, %v2012_v17  ;;  %v393_v37 = vadd.f32 %v361_v60, %v261_v43  ;;  %v1719_v43 = vld [vmem:[%s1997_s27 + $0xc1] sm:$0xff] }
  0x77   : > { %v793_v33 = vadd.f32 %v761_v13, %v693_v20  ;;  %v609_v49 = vadd.f32 %v577_v41, %v508_v59  ;;  %v562_v25 = vmul.f32 %v2625_v61, %v2005_v12  ;;  %v878_v52 = vmul.f32 %v2709_v31, %v2014_v18  ;;  %v2737_v13 = vld [vmem:[%s1997_s27 + $0xc0] sm:$0xff] }
  0x78   : > { %v1109_v55 = vadd.f32 %v1077_v27, %v1009_v7  ;;  %v662_v2 = vmul.f32 %v2636_v42, %v2010_v16  ;;  %v277_v47 = vmul.f32 %v2541_v8, %v1999_v9  ;;  %v493_v51 = vadd.f32 %v461_v62, %v393_v37  ;;  %v2734_v27 = vld [vmem:[%s1997_s27 + $0x172] sm:$0xff]  ;;  %v2749_v20 = vld [vmem:[%s1997_s27 + $0xc2] sm:$0xff] }
  0x79   : > { %v894_v40 = vadd.f32 %v862_v36, %v793_v33  ;;  %v709_v46 = vadd.f32 %v677_v15, %v609_v49  ;;  %v377_v38 = vmul.f32 %v2544_v5, %v2001_v10  ;;  %v978_v54 = vmul.f32 %v2720_v6, %v2016_v19  ;;  %v1703_v49 = vld [vmem:[%s1997_s27 + $0x180] sm:$0xff] }
  0x7a   : > { %1881 = vmatprep.mubr.msk.f32.mxu1 %vm1116_vm1, %v1109_v55  ;;  %v762_v26 = vmul.f32 %v2639_v14, %v2012_v17  ;;  %v477_v8 = vmul.f32 %v2555_v39, %v2003_v11  ;;  %v578_v0 = vmul.f32 %v2653_v32, %v2005_v12  ;;  %v594_v5 = vadd.f32 %v562_v25, %v493_v51  ;;  %v2763_v37 = vld [vmem:[%s1997_s27 + $0x181] sm:$0xff] }
  0x7b   : > { %v994_v63 = vadd.f32 %v962_v1, %v894_v40  ;;  %v809_v45 = vadd.f32 %v777_v34, %v709_v46  ;;  %v409_v53 = vadd.f32 %v377_v38, %v277_v47  ;;  %v1078_v36 = vmul.f32 %v2734_v27, %v2022_v24  ;;  %v2773_v46 = vld [vmem:[%s1997_s27 + $0x182] sm:$0xff] }
  0x7c   : > { %v863_v44 = vmul.f32 %v2737_v13, %v2014_v18  ;;  %v678_v39 = vmul.f32 %v2656_v4, %v2010_v16  ;;  %v262_v41 = vmul.f32 %v2569_v30, %v1999_v9  ;;  %v694_v15 = vadd.f32 %v662_v2, %v594_v5 }
  0x7d   : > { %v1094_v3 = vadd.f32 %v1062_v56, %v994_v63  ;;  %v910_v22 = vadd.f32 %v878_v52, %v809_v45  ;;  %v509_v59 = vadd.f32 %v477_v8, %v409_v53  ;;  %v963_v60 = vmul.f32 %v1719_v43, %v2016_v19  ;;  %v2787_v45 = vld [vmem:[%s1997_s27 + $0xc8] sm:$0xff] }
  0x7e   : > { %v1063_v62 = vmul.f32 %v2749_v20, %v2022_v24  ;;  %v362_v7 = vmul.f32 %v2580_v48, %v2001_v10  ;;  %v462_v30 = vmul.f32 %v2583_v23, %v2003_v11  ;;  %v794_v56 = vadd.f32 %v762_v26, %v694_v15  ;;  %v2801_v15 = vld [vmem:[%s1997_s27 + $0xca] sm:$0xff] }
  0x7f   : > { %1858 = vmatmul.mubr.msk.f32.gmra.mrb[10].mxu0 %vm1116_vm1, %v1094_v3  ;;  %v1010_v1 = vadd.f32 %v978_v54, %v910_v22  ;;  %v610_v34 = vadd.f32 %v578_v0, %v509_v59  ;;  %v778_v33 = vmul.f32 %v2667_v58, %v2012_v17  ;;  %v879_v25 = vmul.f32 %v1703_v49, %v2014_v18  ;;  %v2798_v22 = vld [vmem:[%s1997_s27 + $0xc9] sm:$0xff] }
  0x80   : > { %v979_v48 = vmul.f32 %v2763_v37, %v2016_v19  ;;  %v394_v55 = vadd.f32 %v362_v7, %v262_v41  ;;  %v563_v23 = vmul.f32 %v2681_v28, %v2005_v12  ;;  %v895_v2 = vadd.f32 %v863_v44, %v794_v56 }
  0x81   : > { %v1110_v52 = vadd.f32 %v1078_v36, %v1010_v1  ;;  %v710_v47 = vadd.f32 %v678_v39, %v610_v34  ;;  %v278_v40 = vmul.f32 %v2597_v29, %v1999_v9  ;;  %v663_v38 = vmul.f32 %v2692_v57, %v2010_v16 }
  0x82   : > { %v494_v51 = vadd.f32 %v462_v30, %v394_v55  ;;  %v378_v54 = vmul.f32 %v2608_v35, %v2001_v10  ;;  %v478_v26 = vmul.f32 %v2622_v50, %v2003_v11  ;;  %v995_v8 = vadd.f32 %v963_v60, %v895_v2 }
  0x83   : > { %1882 = vmatmul.mubr.msk.f32.gmra.mrb[10].mxu1 %vm1116_vm1, %v1110_v52  ;;  %v810_v0 = vadd.f32 %v778_v33, %v710_v47  ;;  %v1079_v29 = vmul.f32 %v2773_v46, %v2022_v24  ;;  %v763_v63 = vmul.f32 %v2695_v21, %v2012_v17  ;;  %v864_v35 = vmul.f32 %v2787_v45, %v2014_v18  ;;  %v2825_v47 = vld [vmem:[%s1997_s27 + $0x189] sm:$0xff] }
  0x84   : > { %v595_v5 = vadd.f32 %v563_v23, %v494_v51  ;;  %v410_v53 = vadd.f32 %v378_v54, %v278_v40  ;;  %v579_v50 = vmul.f32 %v2709_v31, %v2005_v12  ;;  %v1095_v36 = vadd.f32 %v1063_v62, %v995_v8  ;;  %v1689_v51 = vld [vmem:[%s1997_s27 + $0xd8] sm:$0xff] }
  0x85   : > { %v911_v44 = vadd.f32 %v879_v25, %v810_v0  ;;  %v679_v39 = vmul.f32 %v2720_v6, %v2010_v16  ;;  %v263_v41 = vmul.f32 %v2625_v61, %v1999_v9  ;;  %v363_v60 = vmul.f32 %v2636_v42, %v2001_v10  ;;  %v2815_v42 = vld [vmem:[%s1997_s27 + $0x188] sm:$0xff] }
  0x86   : > { %v695_v3 = vadd.f32 %v663_v38, %v595_v5  ;;  %v510_v59 = vadd.f32 %v478_v26, %v410_v53  ;;  %v463_v62 = vmul.f32 %v2639_v14, %v2003_v11  ;;  %1860 = vmatprep.mubr.msk.f32.mxu0 %vm1116_vm1, %v1095_v36  ;;  %v964_v30 = vmul.f32 %v2798_v22, %v2016_v19  ;;  %v1768_v0 = vld [vmem:[%s1997_s27 + $0x18a] sm:$0xff]  ;;  %v1753_v36 = vld [vmem:[%s1997_s27 + $0xda] sm:$0xff] }
  0x87   : > { %v1011_v7 = vadd.f32 %v979_v48, %v911_v44  ;;  %v1064_v61 = vmul.f32 %v2801_v15, %v2022_v24  ;;  %v779_v1 = vmul.f32 %v2734_v27, %v2012_v17  ;;  %v395_v33 = vadd.f32 %v363_v60, %v263_v41 }
  0x88   : > { %v795_v56 = vadd.f32 %v763_v63, %v695_v3  ;;  %v611_v34 = vadd.f32 %v579_v50, %v510_v59  ;;  %v564_v14 = vmul.f32 %v2737_v13, %v2005_v12  ;;  %v880_v48 = vmul.f32 %v2815_v42, %v2014_v18 }
  0x89   : > { %v1111_v25 = vadd.f32 %v1079_v29, %v1011_v7  ;;  %v664_v55 = vmul.f32 %v1719_v43, %v2010_v16  ;;  %v279_v23 = vmul.f32 %v2653_v32, %v1999_v9  ;;  %v495_v40 = vadd.f32 %v463_v62, %v395_v33 }
  0x8a   : > { %v896_v52 = vadd.f32 %v864_v35, %v795_v56  ;;  %v711_v2 = vadd.f32 %v679_v39, %v611_v34  ;;  %v379_v13 = vmul.f32 %v2656_v4, %v2001_v10  ;;  %v980_v38 = vmul.f32 %v2825_v47, %v2016_v19  ;;  %v1721_v4 = vld [vmem:[%s1997_s27 + $0xd9] sm:$0xff] }
  0x8b   : > { %1884 = vmatprep.mubr.msk.f32.mxu1 %vm1116_vm1, %v1111_v25  ;;  %v764_v43 = vmul.f32 %v2749_v20, %v2012_v17  ;;  %v479_v32 = vmul.f32 %v2667_v58, %v2003_v11  ;;  %v580_v54 = vmul.f32 %v1703_v49, %v2005_v12  ;;  %v596_v29 = vadd.f32 %v564_v14, %v495_v40  ;;  %v1705_v39 = vld [vmem:[%s1997_s27 + $0x198] sm:$0xff] }
  0x8c   : > { %v996_v26 = vadd.f32 %v964_v30, %v896_v52  ;;  %v811_v8 = vadd.f32 %v779_v1, %v711_v2  ;;  %v411_v63 = vadd.f32 %v379_v13, %v279_v23  ;;  %v1080_v5 = vmul.f32 %v1768_v0, %v2022_v24  ;;  %v1769_v14 = vld [vmem:[%s1997_s27 + $0x19a] sm:$0xff] }
  0x8d   : > { %v865_v35 = vmul.f32 %v1689_v51, %v2014_v18  ;;  %v680_v20 = vmul.f32 %v2763_v37, %v2010_v16  ;;  %v264_v53 = vmul.f32 %v2681_v28, %v1999_v9  ;;  %v696_v50 = vadd.f32 %v664_v55, %v596_v29 }
  0x8e   : > { %v1096_v58 = vadd.f32 %v1064_v61, %v996_v26  ;;  %v912_v49 = vadd.f32 %v880_v48, %v811_v8  ;;  %v511_v44 = vadd.f32 %v479_v32, %v411_v63  ;;  %v965_v41 = vmul.f32 %v1721_v4, %v2016_v19  ;;  %v1737_v61 = vld [vmem:[%s1997_s27 + $0x199] sm:$0xff]  ;;  %v1754_v32 = vld [vmem:[%s1997_s27 + $0xe2] sm:$0xff] }
  0x8f   : > { %v364_v3 = vmul.f32 %v2692_v57, %v2001_v10  ;;  %v464_v59 = vmul.f32 %v2695_v21, %v2003_v11  ;;  %v796_v28 = vadd.f32 %v764_v43, %v696_v50  ;;  %v780_v62 = vmul.f32 %v2773_v46, %v2012_v17  ;;  %v1738_v4 = vld [vmem:[%s1997_s27 + $0x1a1] sm:$0xff] }
  0x90   : > { %1861 = vmatmul.mubr.msk.f32.gmra.mrb[12].mxu0 %vm1116_vm1, %v1096_v58  ;;  %v1012_v37 = vadd.f32 %v980_v38, %v912_v49  ;;  %v612_v60 = vadd.f32 %v580_v54, %v511_v44  ;;  %v1065_v7 = vmul.f32 %v1753_v36, %v2022_v24  ;;  %v881_v30 = vmul.f32 %v1705_v39, %v2014_v18  ;;  %v1706_v54 = vld [vmem:[%s1997_s27 + $0x1a0] sm:$0xff] }
  0x91   : > { %v396_v1 = vadd.f32 %v364_v3, %v264_v53  ;;  %v565_v57 = vmul.f32 %v2787_v45, %v2005_v12  ;;  %v897_v21 = vadd.f32 %v865_v35, %v796_v28  ;;  %v280_v33 = vmul.f32 %v2709_v31, %v1999_v9  ;;  %v1690_v9 = vld [vmem:[%s1997_s27 + $0xe0] sm:$0xff] }
  0x92   : > { %v1112_v56 = vadd.f32 %v1080_v5, %v1012_v37  ;;  %v712_v34 = vadd.f32 %v680_v20, %v612_v60  ;;  %v665_v46 = vmul.f32 %v2798_v22, %v2010_v16  ;;  %v380_v48 = vmul.f32 %v2720_v6, %v2001_v10 }
  0x93   : > { %v496_v25 = vadd.f32 %v464_v59, %v396_v1  ;;  %v480_v55 = vmul.f32 %v2734_v27, %v2003_v11  ;;  %v997_v45 = vadd.f32 %v965_v41, %v897_v21  ;;  %v981_v52 = vmul.f32 %v1737_v61, %v2016_v19  ;;  %v1722_v27 = vld [vmem:[%s1997_s27 + $0xe1] sm:$0xff] }
  0x94   : > { %1885 = vmatmul.mubr.msk.f32.gmra.mrb[12].mxu1 %vm1116_vm1, %v1112_v56  ;;  %v812_v23 = vadd.f32 %v780_v62, %v712_v34  ;;  %v765_v2 = vmul.f32 %v2801_v15, %v2012_v17  ;;  %v412_v22 = vadd.f32 %v380_v48, %v280_v33  ;;  %v581_v10 = vmul.f32 %v2815_v42, %v2005_v12 }
  0x95   : > { %v597_v31 = vadd.f32 %v565_v57, %v496_v25  ;;  %v1097_v6 = vadd.f32 %v1065_v7, %v997_v45  ;;  %v1081_v11 = vmul.f32 %v1769_v14, %v2022_v24  ;;  %v866_v13 = vmul.f32 %v1690_v9, %v2014_v18 }
  0x96   : > { %v913_v40 = vadd.f32 %v881_v30, %v812_v23  ;;  %v512_v38 = vadd.f32 %v480_v55, %v412_v22  ;;  %v681_v43 = vmul.f32 %v2825_v47, %v2010_v16  ;;  %v966_v42 = vmul.f32 %v1722_v27, %v2016_v19  ;;  %v1770_v47 = vld [vmem:[%s1997_s27 + $0x1a2] sm:$0xff] }
  0x97   : > { %v697_v51 = vadd.f32 %v665_v46, %v597_v31  ;;  %1863 = vmatprep.mubr.msk.f32.mxu0 %vm1116_vm1, %v1097_v6  ;;  %v781_v8 = vmul.f32 %v1768_v0, %v2012_v17  ;;  %v1066_v5 = vmul.f32 %v1754_v32, %v2022_v24  ;;  %v882_v16 = vmul.f32 %v1706_v54, %v2014_v18 }
  0x98   : > { %v1013_v15 = vadd.f32 %v981_v52, %v913_v40  ;;  %v613_v26 = vadd.f32 %v581_v10, %v512_v38  ;;  %v982_v58 = vmul.f32 %v1738_v4, %v2016_v19  ;;  %v1082_v17 = vmul.f32 %v1770_v47, %v2022_v24 }
  0x99   : > { %v797_v12 = vadd.f32 %v765_v2, %v697_v51 }
  0x9a   : > { %v1113_v29 = vadd.f32 %v1081_v11, %v1013_v15  ;;  %v713_v35 = vadd.f32 %v681_v43, %v613_v26 }
  0x9b   : > { %v898_v63 = vadd.f32 %v866_v13, %v797_v12 }
  0x9c   : > { %1887 = vmatprep.mubr.msk.f32.mxu1 %vm1116_vm1, %v1113_v29  ;;  %v813_v53 = vadd.f32 %v781_v8, %v713_v35 }
  0x9d   : > { %v998_v20 = vadd.f32 %v966_v42, %v898_v63 }
  0x9e   : > { %v914_v50 = vadd.f32 %v882_v16, %v813_v53 }
  0x9f   : > { %v1098_v49 = vadd.f32 %v1066_v5, %v998_v20 }
  0xa0   : > { %v1014_v0 = vadd.f32 %v982_v58, %v914_v50 }
  0xa1   : > { %1864 = vmatmul.mubr.msk.f32.gmra.mrb[14].mxu0 %vm1116_vm1, %v1098_v49 }
  0xa2   : > { %v1114_v36 = vadd.f32 %v1082_v17, %v1014_v0 }
  0xa4   : > { %1888 = vmatmul.mubr.msk.f32.gmra.mrb[14].mxu1 %vm1116_vm1, %v1114_v36 }
  0xfd   : > { %v1844_v18 = vpop.f32.mrb[0].mxu0 }
  0xfe   : > { %1444 = vst.msk [vmem:[%s2900_s4 + $0x8] sm:$0xff] %vm1442_vm2, %v1844_v18  ;;  %v1283_v19 = vpop.f32.mrb[1].mxu0 }
  0xff   : > { %1443 = vst.msk [vmem:[%s2900_s4] sm:$0xff] %vm1442_vm2, %v1283_v19 }
 0x100   : > { %v1868_v24 = vpop.f32.mrb[0].mxu1 }
 0x101   : > { %1460 = vst.msk [vmem:[%s2900_s4 + $0x88] sm:$0xff] %vm1442_vm2, %v1868_v24  ;;  %v1363_v44 = vpop.f32.mrb[1].mxu1 }
 0x102   : > { %1459 = vst.msk [vmem:[%s2900_s4 + $0x80] sm:$0xff] %vm1442_vm2, %v1363_v44 }
 0x10e   : > { %v1847_v39 = vpop.f32.mrb[2].mxu0 }
 0x10f   : > { %1446 = vst.msk [vmem:[%s2900_s4 + $0x18] sm:$0xff] %vm1442_vm2, %v1847_v39  ;;  %v1293_v41 = vpop.f32.mrb[3].mxu0 }
 0x110   : > { %1445 = vst.msk [vmem:[%s2900_s4 + $0x10] sm:$0xff] %vm1442_vm2, %v1293_v41 }
 0x111   : > { %v1871_v3 = vpop.f32.mrb[2].mxu1 }
 0x112   : > { %1462 = vst.msk [vmem:[%s2900_s4 + $0x98] sm:$0xff] %vm1442_vm2, %v1871_v3  ;;  %v1373_v59 = vpop.f32.mrb[3].mxu1 }
 0x113   : > { %1461 = vst.msk [vmem:[%s2900_s4 + $0x90] sm:$0xff] %vm1442_vm2, %v1373_v59 }
 0x11f   : > { %v1850_v37 = vpop.f32.mrb[4].mxu0 }
 0x120   : > { %1448 = vst.msk [vmem:[%s2900_s4 + $0x28] sm:$0xff] %vm1442_vm2, %v1850_v37  ;;  %v1303_v28 = vpop.f32.mrb[5].mxu0 }
 0x121   : > { %1447 = vst.msk [vmem:[%s2900_s4 + $0x20] sm:$0xff] %vm1442_vm2, %v1303_v28 }
 0x123   : > { %v1874_v60 = vpop.f32.mrb[4].mxu1 }
 0x124   : > { %1464 = vst.msk [vmem:[%s2900_s4 + $0xa8] sm:$0xff] %vm1442_vm2, %v1874_v60  ;;  %v1383_v62 = vpop.f32.mrb[5].mxu1 }
 0x125   : > { %1463 = vst.msk [vmem:[%s2900_s4 + $0xa0] sm:$0xff] %vm1442_vm2, %v1383_v62 }
 0x130   : > { %v1853_v7 = vpop.f32.mrb[6].mxu0 }
 0x131   : > { %1450 = vst.msk [vmem:[%s2900_s4 + $0x38] sm:$0xff] %vm1442_vm2, %v1853_v7  ;;  %v1313_v30 = vpop.f32.mrb[7].mxu0 }
 0x132   : > { %1449 = vst.msk [vmem:[%s2900_s4 + $0x30] sm:$0xff] %vm1442_vm2, %v1313_v30 }
 0x134   : > { %v1877_v61 = vpop.f32.mrb[6].mxu1 }
 0x135   : > { %1466 = vst.msk [vmem:[%s2900_s4 + $0xb8] sm:$0xff] %vm1442_vm2, %v1877_v61  ;;  %v1393_v1 = vpop.f32.mrb[7].mxu1 }
 0x136   : > { %1465 = vst.msk [vmem:[%s2900_s4 + $0xb0] sm:$0xff] %vm1442_vm2, %v1393_v1 }
 0x141   : > { %v1856_v57 = vpop.f32.mrb[8].mxu0 }
 0x142   : > { %1452 = vst.msk [vmem:[%s2900_s4 + $0x48] sm:$0xff] %vm1442_vm2, %v1856_v57  ;;  %v1323_v56 = vpop.f32.mrb[9].mxu0 }
 0x143   : > { %1451 = vst.msk [vmem:[%s2900_s4 + $0x40] sm:$0xff] %vm1442_vm2, %v1323_v56 }
 0x145   : > { %v1880_v21 = vpop.f32.mrb[8].mxu1 }
 0x146   : > { %1468 = vst.msk [vmem:[%s2900_s4 + $0xc8] sm:$0xff] %vm1442_vm2, %v1880_v21  ;;  %v1403_v34 = vpop.f32.mrb[9].mxu1 }
 0x147   : > { %1467 = vst.msk [vmem:[%s2900_s4 + $0xc0] sm:$0xff] %vm1442_vm2, %v1403_v34 }
 0x152   : > { %v1859_v33 = vpop.f32.mrb[10].mxu0 }
 0x153   : > { %1454 = vst.msk [vmem:[%s2900_s4 + $0x58] sm:$0xff] %vm1442_vm2, %v1859_v33  ;;  %v1333_v14 = vpop.f32.mrb[11].mxu0 }
 0x154   : > { %1453 = vst.msk [vmem:[%s2900_s4 + $0x50] sm:$0xff] %vm1442_vm2, %v1333_v14 }
 0x156   : > { %v1883_v25 = vpop.f32.mrb[10].mxu1 }
 0x157   : > { %1470 = vst.msk [vmem:[%s2900_s4 + $0xd8] sm:$0xff] %vm1442_vm2, %v1883_v25  ;;  %v1413_v46 = vpop.f32.mrb[11].mxu1 }
 0x158   : > { %1469 = vst.msk [vmem:[%s2900_s4 + $0xd0] sm:$0xff] %vm1442_vm2, %v1413_v46 }
 0x163   : > { %v1862_v48 = vpop.f32.mrb[12].mxu0 }
 0x164   : > { %1456 = vst.msk [vmem:[%s2900_s4 + $0x68] sm:$0xff] %vm1442_vm2, %v1862_v48  ;;  %v1343_v55 = vpop.f32.mrb[13].mxu0 }
 0x165   : > { %1455 = vst.msk [vmem:[%s2900_s4 + $0x60] sm:$0xff] %vm1442_vm2, %v1343_v55 }
 0x167   : > { %v1886_v45 = vpop.f32.mrb[12].mxu1 }
 0x168   : > { %1472 = vst.msk [vmem:[%s2900_s4 + $0xe8] sm:$0xff] %vm1442_vm2, %v1886_v45  ;;  %v1423_v23 = vpop.f32.mrb[13].mxu1 }
 0x169   : > { %1471 = vst.msk [vmem:[%s2900_s4 + $0xe0] sm:$0xff] %vm1442_vm2, %v1423_v23 }
 0x174   : > { %v1865_v52 = vpop.f32.mrb[14].mxu0 }
 0x175   : > { %1458 = vst.msk [vmem:[%s2900_s4 + $0x78] sm:$0xff] %vm1442_vm2, %v1865_v52  ;;  %v1353_v9 = vpop.f32.mrb[15].mxu0 }
 0x176   : > { %1457 = vst.msk [vmem:[%s2900_s4 + $0x70] sm:$0xff] %vm1442_vm2, %v1353_v9 }
 0x177   : > { %v1889_v31 = vpop.f32.mrb[14].mxu1 }
 0x178   : > { %1474 = vst.msk [vmem:[%s2900_s4 + $0xf8] sm:$0xff] %vm1442_vm2, %v1889_v31  ;;  %v1433_v2 = vpop.f32.mrb[15].mxu1 }
 0x179   : > { %1473 = vst.msk [vmem:[%s2900_s4 + $0xf0] sm:$0xff] %vm1442_vm2, %v1433_v2 }
 0x17a PF: > { %s13_s14 = sadd.s32 1, %s1939_s14   ;;  %s2979_s12 = smov %s1935_s13 }
 0x17b   : > { %p10_p5 = scmp.ge.s32.totalorder %s13_s14, 4   ;;  %s2980_s13 = smov %s2982_s15 }
 0x17d   :  { %12 = sbr.rel (!%p10_p5) target bundleno = 2 (0x2), region = 64 }

</bundles_post_ra>
